<compile_context>
chip_gen: v7x
topology: tpu7x:2x2x1
jax: 0.10.0
libtpu: 0.0.40
codegen_flags: <defaults>
</compile_context>

<pallas_src>
import math

import jax
import jax.numpy as jnp
from jax.experimental import pallas as pl
from jax.experimental.pallas import tpu as pltpu

# ----------------------------- model hyper-params -----------------------------
VOCAB = 50
D_MODEL = 32
N_HEADS = 4
D_Q = 8           # d_queries == d_keys
D_V = 8           # d_values
D_INNER = 64
N_LAYERS = 2
MAX_LEN = 16
LN_EPS = 1e-5
NEG_BIG = -1e30   # finite mask constant (avoids inf - inf -> NaN)


def _layer_norm(x, w, b):
    mu = jnp.mean(x, axis=-1, keepdims=True)
    var = jnp.mean(jnp.square(x - mu), axis=-1, keepdims=True)
    return (x - mu) * jax.lax.rsqrt(var + LN_EPS) * w + b


def _full(shape):
    # whole-array block, constant across the grid
    return pl.BlockSpec(shape, lambda *_: (0,) * len(shape))


# ------------------------------- fused kernel ----------------------------------
def encoder_kernel(len_ref,                       # (B,) scalar-prefetch, SMEM
                   x_ref, pe_ref,                 # (1,S,D), (S,D)
                   ln1w_ref, ln1b_ref,            # (L,1,D) x2
                   wq_ref, bq_ref,                # (L,H,D,Dq), (L,H,1,Dq)
                   wk_ref, bk_ref,                # (L,H,D,Dq), (L,H,1,Dq)
                   wv_ref, bv_ref,                # (L,H,D,Dv), (L,H,1,Dv)
                   wo_ref, bo_ref,                # (L,H,Dv,D), (L,1,D)
                   ln2w_ref, ln2b_ref,            # (L,1,D) x2
                   w1_ref, b1_ref,                # (L,D,DI), (L,1,DI)
                   w2_ref, b2_ref,                # (L,DI,D), (L,1,D)
                   lnfw_ref, lnfb_ref,            # (1,D) x2
                   o_ref):                        # (1,S,D)
    b = pl.program_id(0)
    length = len_ref[b]                            # valid key length for this sequence
    S = x_ref.shape[1]

    # embedding scale + positional encoding (gather done in XLA, folded here)
    x = x_ref[0] * math.sqrt(D_MODEL) + pe_ref[...]          # (S, D)

    key_idx = jax.lax.broadcasted_iota(jnp.int32, (1, S, S), 2)
    mask = key_idx < length                                    # (1,S,S), broadcasts over heads
    inv_sqrt_dk = 1.0 / math.sqrt(D_Q)

    for l in range(N_LAYERS):                                  # static unroll over layers
        # ---------------- MultiHeadAttention (self-attention, pre-LN) ----------------
        ln = _layer_norm(x, ln1w_ref[l], ln1b_ref[l])          # (S, D)
        ln_h = jnp.broadcast_to(ln[None], (N_HEADS, S, D_MODEL))   # (H, S, D)

        q = jnp.einsum('hsd,hde->hse', ln_h, wq_ref[l],
                       preferred_element_type=jnp.float32) + bq_ref[l]   # (H,S,Dq)
        k = jnp.einsum('hsd,hde->hse', ln_h, wk_ref[l],
                       preferred_element_type=jnp.float32) + bk_ref[l]   # (H,S,Dq)
        v = jnp.einsum('hsd,hde->hse', ln_h, wv_ref[l],
                       preferred_element_type=jnp.float32) + bv_ref[l]   # (H,S,Dv)

        s = jnp.einsum('hqe,hke->hqk', q, k,
                       preferred_element_type=jnp.float32) * inv_sqrt_dk  # (H,S,S)
        s = jnp.where(mask, s, NEG_BIG)
        s = s - jnp.max(s, axis=-1, keepdims=True)
        p = jnp.exp(s)
        p = p / jnp.sum(p, axis=-1, keepdims=True)             # softmax over keys

        ctx = jnp.einsum('hqk,hke->hqe', p, v,
                         preferred_element_type=jnp.float32)   # (H,S,Dv)
        att = jnp.einsum('hqe,hed->hqd', ctx, wo_ref[l],
                         preferred_element_type=jnp.float32)   # (H,S,D)
        x = jnp.sum(att, axis=0) + bo_ref[l] + x               # output proj + residual

        # ------------------------------- FFN (pre-LN) --------------------------------
        ln = _layer_norm(x, ln2w_ref[l], ln2b_ref[l])
        h = jnp.dot(ln, w1_ref[l], preferred_element_type=jnp.float32) + b1_ref[l]
        h = jnp.maximum(h, 0.0)
        x = jnp.dot(h, w2_ref[l], preferred_element_type=jnp.float32) + b2_ref[l] + x

    o_ref[0] = _layer_norm(x, lnfw_ref[...], lnfb_ref[...])


# ------------------------------- host wrapper -----------------------------------
def _prepare_stacked_params(params):
    """Pre-split Q/K/V/O weights per head and stack all layer params over layers."""
    HQ = N_HEADS * D_Q
    mhas = [layer["mha"] for layer in params["layers"]]
    ffns = [layer["ffn"] for layer in params["layers"]]

    def split_heads_w(w, dh):     # (D, H*dh) -> (H, D, dh)
        return w.reshape(D_MODEL, N_HEADS, dh).transpose(1, 0, 2)

    def split_heads_b(b, dh):     # (1, H*dh) -> (H, 1, dh)
        return b.reshape(1, N_HEADS, dh).transpose(1, 0, 2)

    stk = lambda xs: jnp.stack(xs, axis=0)
    return {
        "ln1_w": stk([m["ln_w"] for m in mhas]),
        "ln1_b": stk([m["ln_b"] for m in mhas]),
        "wq": stk([split_heads_w(m["wq"], D_Q) for m in mhas]),
        "bq": stk([split_heads_b(m["bq"], D_Q) for m in mhas]),
        "wk": stk([split_heads_w(m["wkv"][:, :HQ], D_Q) for m in mhas]),
        "bk": stk([split_heads_b(m["bkv"][:, :HQ], D_Q) for m in mhas]),
        "wv": stk([split_heads_w(m["wkv"][:, HQ:], D_V) for m in mhas]),
        "bv": stk([split_heads_b(m["bkv"][:, HQ:], D_V) for m in mhas]),
        "wo": stk([m["wo"].reshape(N_HEADS, D_V, D_MODEL) for m in mhas]),
        "bo": stk([m["bo"] for m in mhas]),
        "ln2_w": stk([f["ln_w"] for f in ffns]),
        "ln2_b": stk([f["ln_b"] for f in ffns]),
        "w1": stk([f["w1"] for f in ffns]),
        "b1": stk([f["b1"] for f in ffns]),
        "w2": stk([f["w2"] for f in ffns]),
        "b2": stk([f["b2"] for f in ffns]),
    }


def encoder_call(x_emb, pe, lengths, sp, lnf_w, lnf_b):
    B, S, D = x_emb.shape
    L, H = N_LAYERS, N_HEADS
    grid_spec = pltpu.PrefetchScalarGridSpec(
        num_scalar_prefetch=1,
        grid=(B,),
        in_specs=[
            pl.BlockSpec((1, S, D), lambda b, L_: (b, 0, 0)),   # x (embedded tokens)
            _full((S, D)),                                      # positional encoding
            _full((L, 1, D)), _full((L, 1, D)),                 # MHA layer-norm
            _full((L, H, D, D_Q)), _full((L, H, 1, D_Q)),       # wq, bq (per head)
            _full((L, H, D, D_Q)), _full((L, H, 1, D_Q)),       # wk, bk
            _full((L, H, D, D_V)), _full((L, H, 1, D_V)),       # wv, bv
            _full((L, H, D_V, D)), _full((L, 1, D)),            # wo, bo
            _full((L, 1, D)), _full((L, 1, D)),                 # FFN layer-norm
            _full((L, D, D_INNER)), _full((L, 1, D_INNER)),     # w1, b1
            _full((L, D_INNER, D)), _full((L, 1, D)),           # w2, b2
            _full((1, D)), _full((1, D)),                       # final layer-norm
        ],
        out_specs=pl.BlockSpec((1, S, D), lambda b, L_: (b, 0, 0)),
    )
    return pl.pallas_call(
        encoder_kernel,
        out_shape=jax.ShapeDtypeStruct((B, S, D), jnp.float32),
        grid_spec=grid_spec,
        compiler_params=pltpu.CompilerParams(dimension_semantics=("parallel",)),
    )(lengths, x_emb, pe,
      sp["ln1_w"], sp["ln1_b"], sp["wq"], sp["bq"], sp["wk"], sp["bk"],
      sp["wv"], sp["bv"], sp["wo"], sp["bo"],
      sp["ln2_w"], sp["ln2_b"], sp["w1"], sp["b1"], sp["w2"], sp["b2"],
      lnf_w, lnf_b)


@jax.jit
def encoder_forward(tokens, lengths, params):
    B, S = tokens.shape
    # Tiny row gather in XLA (replaces the old (B,S,V) one-hot + matmul).
    x_emb = jnp.take(params["emb"], tokens, axis=0)            # (B, S, D)
    pe = params["pos_enc"][0, :S, :]                           # (S, D)
    sp = _prepare_stacked_params(params)                       # cheap reshapes/stacks
    return encoder_call(x_emb, pe, lengths, sp, params["ln_w"], params["ln_b"])


# --------------------------- pure-JAX reference ----------------------------------
def ref_forward(tokens, lengths, params):
    B, S = tokens.shape
    x = params["emb"][tokens] * math.sqrt(D_MODEL) + params["pos_enc"][:, :S, :]
    key_idx = jnp.arange(S)[None, None, None, :]
    mask = key_idx < lengths[:, None, None, None]
    for layer in params["layers"]:
        p = layer["mha"]
        ln = _layer_norm(x, p["ln_w"], p["ln_b"])
        q = ln @ p["wq"] + p["bq"]
        kv = ln @ p["wkv"] + p["bkv"]
        k, v = kv[..., : N_HEADS * D_Q], kv[..., N_HEADS * D_Q:]
        q = q.reshape(B, S, N_HEADS, D_Q).transpose(0, 2, 1, 3)
        k = k.reshape(B, S, N_HEADS, D_Q).transpose(0, 2, 1, 3)
        v = v.reshape(B, S, N_HEADS, D_V).transpose(0, 2, 1, 3)
        s = jnp.einsum("bhqd,bhkd->bhqk", q, k,
                       precision=jax.lax.Precision.HIGHEST) / math.sqrt(D_Q)
        s = jnp.where(mask, s, -jnp.inf)
        att = jax.nn.softmax(s, axis=-1)
        ctx = jnp.einsum("bhqk,bhkd->bhqd", att, v,
                         precision=jax.lax.Precision.HIGHEST)
        ctx = ctx.transpose(0, 2, 1, 3).reshape(B, S, N_HEADS * D_V)
        x = ctx @ p["wo"] + p["bo"] + x
        p = layer["ffn"]
        ln = _layer_norm(x, p["ln_w"], p["ln_b"])
        h = jnp.maximum(ln @ p["w1"] + p["b1"], 0.0)
        x = h @ p["w2"] + p["b2"] + x
    return _layer_norm(x, params["ln_w"], params["ln_b"])


# ------------------------------ parameter init ------------------------------------
def make_positional_encoding(max_len, d_model):
    pos = jnp.arange(max_len, dtype=jnp.float32)[:, None]
    div = jnp.exp(jnp.arange(0, d_model, 2, dtype=jnp.float32) *
                  (-math.log(10000.0) / d_model))
    pe = jnp.zeros((max_len, d_model), jnp.float32)
    pe = pe.at[:, 0::2].set(jnp.sin(pos * div))
    pe = pe.at[:, 1::2].set(jnp.cos(pos * div))
    return pe[None]  # (1, max_len, d_model)


def init_params(key):
    def nrm(k, shape, scale=0.05):
        return (scale * jax.random.normal(k, shape)).astype(jnp.float32)

    keys = jax.random.split(key, 2 + 12 * N_LAYERS)
    it = iter(keys)
    params = {
        "emb": nrm(next(it), (VOCAB, D_MODEL), 1.0),
        "pos_enc": make_positional_encoding(MAX_LEN, D_MODEL),
        "ln_w": jnp.ones((1, D_MODEL), jnp.float32),
        "ln_b": jnp.zeros((1, D_MODEL), jnp.float32),
        "layers": [],
    }
    for _ in range(N_LAYERS):
        mha = {
            "ln_w": jnp.ones((1, D_MODEL), jnp.float32),
            "ln_b": jnp.zeros((1, D_MODEL), jnp.float32),
            "wq": nrm(next(it), (D_MODEL, N_HEADS * D_Q)),
            "bq": nrm(next(it), (1, N_HEADS * D_Q)),
            "wkv": nrm(next(it), (D_MODEL, N_HEADS * (D_Q + D_V))),
            "bkv": nrm(next(it), (1, N_HEADS * (D_Q + D_V))),
            "wo": nrm(next(it), (N_HEADS * D_V, D_MODEL)),
            "bo": nrm(next(it), (1, D_MODEL)),
        }
        ffn = {
            "ln_w": jnp.ones((1, D_MODEL), jnp.float32),
            "ln_b": jnp.zeros((1, D_MODEL), jnp.float32),
            "w1": nrm(next(it), (D_MODEL, D_INNER)),
            "b1": nrm(next(it), (1, D_INNER)),
            "w2": nrm(next(it), (D_INNER, D_MODEL)),
            "b2": nrm(next(it), (1, D_MODEL)),
        }
        params["layers"].append({"mha": mha, "ffn": ffn})
    return params


if __name__ == "__main__":
    B, S = 2, 8
    key = jax.random.PRNGKey(0)
    k_tok, k_par = jax.random.split(key)
    tokens = jax.random.randint(k_tok, (B, S), 0, VOCAB, dtype=jnp.int32)
    lengths = jnp.array([S, 5], dtype=jnp.int32)   # second sequence has padding
    params = init_params(k_par)

    out = encoder_forward(tokens, lengths, params)
    out = jax.block_until_ready(out)

    ref = ref_forward(tokens, lengths, params)
    assert out.shape == (B, S, D_MODEL)
    assert jnp.all(jnp.isfinite(out))
    assert jnp.allclose(out, ref, rtol=2e-2, atol=2e-2)

    print("KERNEL_OK")
</pallas_src>

<mosaic_0001>
module attributes {stable_mosaic.version = 11 : i64} {
  func.func @encoder_kernel(%arg0: i32, %arg1: memref<2xi32, #tpu.memory_space<smem>>, %arg2: memref<1x8x32xf32, #tpu.memory_space<vmem>>, %arg3: memref<8x32xf32, #tpu.memory_space<vmem>>, %arg4: memref<2x1x32xf32, #tpu.memory_space<vmem>>, %arg5: memref<2x1x32xf32, #tpu.memory_space<vmem>>, %arg6: memref<2x4x32x8xf32, #tpu.memory_space<vmem>>, %arg7: memref<2x4x1x8xf32, #tpu.memory_space<vmem>>, %arg8: memref<2x4x32x8xf32, #tpu.memory_space<vmem>>, %arg9: memref<2x4x1x8xf32, #tpu.memory_space<vmem>>, %arg10: memref<2x4x32x8xf32, #tpu.memory_space<vmem>>, %arg11: memref<2x4x1x8xf32, #tpu.memory_space<vmem>>, %arg12: memref<2x4x8x32xf32, #tpu.memory_space<vmem>>, %arg13: memref<2x1x32xf32, #tpu.memory_space<vmem>>, %arg14: memref<2x1x32xf32, #tpu.memory_space<vmem>>, %arg15: memref<2x1x32xf32, #tpu.memory_space<vmem>>, %arg16: memref<2x32x64xf32, #tpu.memory_space<vmem>>, %arg17: memref<2x1x64xf32, #tpu.memory_space<vmem>>, %arg18: memref<2x64x32xf32, #tpu.memory_space<vmem>>, %arg19: memref<2x1x32xf32, #tpu.memory_space<vmem>>, %arg20: memref<1x32xf32, #tpu.memory_space<vmem>>, %arg21: memref<1x32xf32, #tpu.memory_space<vmem>>, %arg22: memref<1x8x32xf32, #tpu.memory_space<vmem>>) attributes {dimension_semantics = [#tpu.dimension_semantics<parallel>], iteration_bounds = array<i64: 2>, scalar_prefetch = 1 : i64, scratch_operands = 0 : i64, tpu.core_type = #tpu.core_type<tc>, window_params = [{transform_indices = @transform_0, window_bounds = array<i64: 1, 8, 32>}, {pipeline_mode = #tpu.pipeline_mode<synchronous>, transform_indices = @transform_1, window_bounds = array<i64: 8, 32>}, {pipeline_mode = #tpu.pipeline_mode<synchronous>, transform_indices = @transform_2, window_bounds = array<i64: 2, 1, 32>}, {pipeline_mode = #tpu.pipeline_mode<synchronous>, transform_indices = @transform_3, window_bounds = array<i64: 2, 1, 32>}, {pipeline_mode = #tpu.pipeline_mode<synchronous>, transform_indices = @transform_4, window_bounds = array<i64: 2, 4, 32, 8>}, {pipeline_mode = #tpu.pipeline_mode<synchronous>, transform_indices = @transform_5, window_bounds = array<i64: 2, 4, 1, 8>}, {pipeline_mode = #tpu.pipeline_mode<synchronous>, transform_indices = @transform_6, window_bounds = array<i64: 2, 4, 32, 8>}, {pipeline_mode = #tpu.pipeline_mode<synchronous>, transform_indices = @transform_7, window_bounds = array<i64: 2, 4, 1, 8>}, {pipeline_mode = #tpu.pipeline_mode<synchronous>, transform_indices = @transform_8, window_bounds = array<i64: 2, 4, 32, 8>}, {pipeline_mode = #tpu.pipeline_mode<synchronous>, transform_indices = @transform_9, window_bounds = array<i64: 2, 4, 1, 8>}, {pipeline_mode = #tpu.pipeline_mode<synchronous>, transform_indices = @transform_10, window_bounds = array<i64: 2, 4, 8, 32>}, {pipeline_mode = #tpu.pipeline_mode<synchronous>, transform_indices = @transform_11, window_bounds = array<i64: 2, 1, 32>}, {pipeline_mode = #tpu.pipeline_mode<synchronous>, transform_indices = @transform_12, window_bounds = array<i64: 2, 1, 32>}, {pipeline_mode = #tpu.pipeline_mode<synchronous>, transform_indices = @transform_13, window_bounds = array<i64: 2, 1, 32>}, {pipeline_mode = #tpu.pipeline_mode<synchronous>, transform_indices = @transform_14, window_bounds = array<i64: 2, 32, 64>}, {pipeline_mode = #tpu.pipeline_mode<synchronous>, transform_indices = @transform_15, window_bounds = array<i64: 2, 1, 64>}, {pipeline_mode = #tpu.pipeline_mode<synchronous>, transform_indices = @transform_16, window_bounds = array<i64: 2, 64, 32>}, {pipeline_mode = #tpu.pipeline_mode<synchronous>, transform_indices = @transform_17, window_bounds = array<i64: 2, 1, 32>}, {pipeline_mode = #tpu.pipeline_mode<synchronous>, transform_indices = @transform_18, window_bounds = array<i64: 1, 32>}, {pipeline_mode = #tpu.pipeline_mode<synchronous>, transform_indices = @transform_19, window_bounds = array<i64: 1, 32>}, {transform_indices = @transform_20, window_bounds = array<i64: 1, 8, 32>}]} {
    %0 = arith.index_cast %arg0 : i32 to index
    %1 = memref.load %arg1[%0] : memref<2xi32, #tpu.memory_space<smem>>
    %c0 = arith.constant 0 : index
    %c0_0 = arith.constant 0 : index
    %c0_1 = arith.constant 0 : index
    %2 = vector.load %arg2[%c0, %c0_0, %c0_1] : memref<1x8x32xf32, #tpu.memory_space<vmem>>, vector<1x8x32xf32>
    %3 = vector.shape_cast %2 : vector<1x8x32xf32> to vector<8x32xf32>
    %cst = arith.constant 5.65685415 : f32
    %4 = vector.broadcast %cst : f32 to vector<8x32xf32>
    %5 = arith.mulf %3, %4 : vector<8x32xf32>
    %c0_2 = arith.constant 0 : index
    %c0_3 = arith.constant 0 : index
    %6 = vector.load %arg3[%c0_2, %c0_3] : memref<8x32xf32, #tpu.memory_space<vmem>>, vector<8x32xf32>
    %7 = arith.addf %5, %6 : vector<8x32xf32>
    %8 = tpu.iota {dimensions = array<i32: 2>} : vector<1x8x8xi32>
    %9 = vector.broadcast %1 : i32 to vector<1x8x8xi32>
    %10 = arith.cmpi slt, %8, %9 : vector<1x8x8xi32>
    %c0_4 = arith.constant 0 : index
    %c0_5 = arith.constant 0 : index
    %c0_6 = arith.constant 0 : index
    %11 = vector.load %arg4[%c0_4, %c0_5, %c0_6] : memref<2x1x32xf32, #tpu.memory_space<vmem>>, vector<1x1x32xf32>
    %12 = vector.shape_cast %11 : vector<1x1x32xf32> to vector<1x32xf32>
    %c0_7 = arith.constant 0 : index
    %c0_8 = arith.constant 0 : index
    %c0_9 = arith.constant 0 : index
    %13 = vector.load %arg5[%c0_7, %c0_8, %c0_9] : memref<2x1x32xf32, #tpu.memory_space<vmem>>, vector<1x1x32xf32>
    %14 = vector.shape_cast %13 : vector<1x1x32xf32> to vector<1x32xf32>
    %cst_10 = arith.constant dense<0.000000e+00> : vector<8xf32>
    %15 = vector.multi_reduction <add>, %7, %cst_10 [1] : vector<8x32xf32> to vector<8xf32>
    %16 = vector.shape_cast %15 : vector<8xf32> to vector<8x1xf32>
    %cst_11 = arith.constant 3.200000e+01 : f32
    %17 = vector.broadcast %cst_11 : f32 to vector<8x1xf32>
    %18 = arith.divf %16, %17 : vector<8x1xf32>
    %19 = vector.broadcast %18 : vector<8x1xf32> to vector<8x32xf32>
    %20 = arith.subf %7, %19 : vector<8x32xf32>
    %21 = arith.mulf %20, %20 : vector<8x32xf32>
    %cst_12 = arith.constant dense<0.000000e+00> : vector<8xf32>
    %22 = vector.multi_reduction <add>, %21, %cst_12 [1] : vector<8x32xf32> to vector<8xf32>
    %23 = vector.shape_cast %22 : vector<8xf32> to vector<8x1xf32>
    %cst_13 = arith.constant 3.200000e+01 : f32
    %24 = vector.broadcast %cst_13 : f32 to vector<8x1xf32>
    %25 = arith.divf %23, %24 : vector<8x1xf32>
    %26 = vector.broadcast %18 : vector<8x1xf32> to vector<8x32xf32>
    %27 = arith.subf %7, %26 : vector<8x32xf32>
    %cst_14 = arith.constant 9.99999974E-6 : f32
    %28 = vector.broadcast %cst_14 : f32 to vector<8x1xf32>
    %29 = arith.addf %25, %28 : vector<8x1xf32>
    %30 = math.rsqrt %29 : vector<8x1xf32>
    %31 = vector.broadcast %30 : vector<8x1xf32> to vector<8x32xf32>
    %32 = arith.mulf %27, %31 : vector<8x32xf32>
    %33 = vector.broadcast %12 : vector<1x32xf32> to vector<8x32xf32>
    %34 = arith.mulf %32, %33 : vector<8x32xf32>
    %35 = vector.broadcast %14 : vector<1x32xf32> to vector<8x32xf32>
    %36 = arith.addf %34, %35 : vector<8x32xf32>
    %37 = vector.shape_cast %36 : vector<8x32xf32> to vector<1x8x32xf32>
    %38 = vector.shape_cast %37 : vector<1x8x32xf32> to vector<1x8x32xf32>
    %39 = vector.broadcast %38 : vector<1x8x32xf32> to vector<4x8x32xf32>
    %c0_15 = arith.constant 0 : index
    %c0_16 = arith.constant 0 : index
    %c0_17 = arith.constant 0 : index
    %c0_18 = arith.constant 0 : index
    %40 = vector.load %arg6[%c0_15, %c0_16, %c0_17, %c0_18] : memref<2x4x32x8xf32, #tpu.memory_space<vmem>>, vector<1x4x32x8xf32>
    %41 = vector.shape_cast %40 : vector<1x4x32x8xf32> to vector<4x32x8xf32>
    "tpu.trace_start"() <{level = 10 : i32, message = "hsd,hde->hse"}> : () -> ()
    %cst_19 = arith.constant dense<0.000000e+00> : vector<4x8x8xf32>
    %42 = tpu.matmul %39, %41, %cst_19 {dimension_numbers = #tpu.dot_dimension_numbers<[2], [1], [1], [2], [0, 0, 0, 1, 1, 2], [0], [0]>} : vector<4x8x32xf32>, vector<4x32x8xf32>, vector<4x8x8xf32> -> vector<4x8x8xf32>
    "tpu.trace_stop"() : () -> ()
    %c0_20 = arith.constant 0 : index
    %c0_21 = arith.constant 0 : index
    %c0_22 = arith.constant 0 : index
    %c0_23 = arith.constant 0 : index
    %43 = vector.load %arg7[%c0_20, %c0_21, %c0_22, %c0_23] : memref<2x4x1x8xf32, #tpu.memory_space<vmem>>, vector<1x4x1x8xf32>
    %44 = vector.shape_cast %43 : vector<1x4x1x8xf32> to vector<4x1x8xf32>
    %45 = vector.broadcast %44 : vector<4x1x8xf32> to vector<4x8x8xf32>
    %46 = arith.addf %42, %45 : vector<4x8x8xf32>
    %c0_24 = arith.constant 0 : index
    %c0_25 = arith.constant 0 : index
    %c0_26 = arith.constant 0 : index
    %c0_27 = arith.constant 0 : index
    %47 = vector.load %arg8[%c0_24, %c0_25, %c0_26, %c0_27] : memref<2x4x32x8xf32, #tpu.memory_space<vmem>>, vector<1x4x32x8xf32>
    %48 = vector.shape_cast %47 : vector<1x4x32x8xf32> to vector<4x32x8xf32>
    "tpu.trace_start"() <{level = 10 : i32, message = "hsd,hde->hse"}> : () -> ()
    %cst_28 = arith.constant dense<0.000000e+00> : vector<4x8x8xf32>
    %49 = tpu.matmul %39, %48, %cst_28 {dimension_numbers = #tpu.dot_dimension_numbers<[2], [1], [1], [2], [0, 0, 0, 1, 1, 2], [0], [0]>} : vector<4x8x32xf32>, vector<4x32x8xf32>, vector<4x8x8xf32> -> vector<4x8x8xf32>
    "tpu.trace_stop"() : () -> ()
    %c0_29 = arith.constant 0 : index
    %c0_30 = arith.constant 0 : index
    %c0_31 = arith.constant 0 : index
    %c0_32 = arith.constant 0 : index
    %50 = vector.load %arg9[%c0_29, %c0_30, %c0_31, %c0_32] : memref<2x4x1x8xf32, #tpu.memory_space<vmem>>, vector<1x4x1x8xf32>
    %51 = vector.shape_cast %50 : vector<1x4x1x8xf32> to vector<4x1x8xf32>
    %52 = vector.broadcast %51 : vector<4x1x8xf32> to vector<4x8x8xf32>
    %53 = arith.addf %49, %52 : vector<4x8x8xf32>
    %c0_33 = arith.constant 0 : index
    %c0_34 = arith.constant 0 : index
    %c0_35 = arith.constant 0 : index
    %c0_36 = arith.constant 0 : index
    %54 = vector.load %arg10[%c0_33, %c0_34, %c0_35, %c0_36] : memref<2x4x32x8xf32, #tpu.memory_space<vmem>>, vector<1x4x32x8xf32>
    %55 = vector.shape_cast %54 : vector<1x4x32x8xf32> to vector<4x32x8xf32>
    "tpu.trace_start"() <{level = 10 : i32, message = "hsd,hde->hse"}> : () -> ()
    %cst_37 = arith.constant dense<0.000000e+00> : vector<4x8x8xf32>
    %56 = tpu.matmul %39, %55, %cst_37 {dimension_numbers = #tpu.dot_dimension_numbers<[2], [1], [1], [2], [0, 0, 0, 1, 1, 2], [0], [0]>} : vector<4x8x32xf32>, vector<4x32x8xf32>, vector<4x8x8xf32> -> vector<4x8x8xf32>
    "tpu.trace_stop"() : () -> ()
    %c0_38 = arith.constant 0 : index
    %c0_39 = arith.constant 0 : index
    %c0_40 = arith.constant 0 : index
    %c0_41 = arith.constant 0 : index
    %57 = vector.load %arg11[%c0_38, %c0_39, %c0_40, %c0_41] : memref<2x4x1x8xf32, #tpu.memory_space<vmem>>, vector<1x4x1x8xf32>
    %58 = vector.shape_cast %57 : vector<1x4x1x8xf32> to vector<4x1x8xf32>
    %59 = vector.broadcast %58 : vector<4x1x8xf32> to vector<4x8x8xf32>
    %60 = arith.addf %56, %59 : vector<4x8x8xf32>
    "tpu.trace_start"() <{level = 10 : i32, message = "hqe,hke->hqk"}> : () -> ()
    %cst_42 = arith.constant dense<0.000000e+00> : vector<4x8x8xf32>
    %61 = tpu.matmul %46, %53, %cst_42 {dimension_numbers = #tpu.dot_dimension_numbers<[2], [2], [1], [1], [0, 0, 0, 1, 1, 1], [0], [0]>} : vector<4x8x8xf32>, vector<4x8x8xf32>, vector<4x8x8xf32> -> vector<4x8x8xf32>
    "tpu.trace_stop"() : () -> ()
    %cst_43 = arith.constant 0.353553385 : f32
    %62 = vector.broadcast %cst_43 : f32 to vector<4x8x8xf32>
    %63 = arith.mulf %61, %62 : vector<4x8x8xf32>
    %cst_44 = arith.constant -1.000000e+30 : f32
    %64 = vector.shape_cast %10 : vector<1x8x8xi1> to vector<1x8x8xi1>
    %65 = vector.broadcast %64 : vector<1x8x8xi1> to vector<4x8x8xi1>
    %66 = vector.broadcast %cst_44 : f32 to vector<4x8x8xf32>
    %67 = arith.select %65, %63, %66 : vector<4x8x8xi1>, vector<4x8x8xf32>
    %cst_45 = arith.constant dense<0xFF800000> : vector<4x8xf32>
    %68 = vector.multi_reduction <maximumf>, %67, %cst_45 [2] : vector<4x8x8xf32> to vector<4x8xf32>
    %69 = vector.shape_cast %68 : vector<4x8xf32> to vector<4x8x1xf32>
    %70 = vector.broadcast %69 : vector<4x8x1xf32> to vector<4x8x8xf32>
    %71 = arith.subf %67, %70 : vector<4x8x8xf32>
    %72 = math.exp %71 : vector<4x8x8xf32>
    %cst_46 = arith.constant dense<0.000000e+00> : vector<4x8xf32>
    %73 = vector.multi_reduction <add>, %72, %cst_46 [2] : vector<4x8x8xf32> to vector<4x8xf32>
    %74 = vector.shape_cast %73 : vector<4x8xf32> to vector<4x8x1xf32>
    %75 = vector.broadcast %74 : vector<4x8x1xf32> to vector<4x8x8xf32>
    %76 = arith.divf %72, %75 : vector<4x8x8xf32>
    "tpu.trace_start"() <{level = 10 : i32, message = "hqk,hke->hqe"}> : () -> ()
    %cst_47 = arith.constant dense<0.000000e+00> : vector<4x8x8xf32>
    %77 = tpu.matmul %76, %60, %cst_47 {dimension_numbers = #tpu.dot_dimension_numbers<[2], [1], [1], [2], [0, 0, 0, 1, 1, 2], [0], [0]>} : vector<4x8x8xf32>, vector<4x8x8xf32>, vector<4x8x8xf32> -> vector<4x8x8xf32>
    "tpu.trace_stop"() : () -> ()
    %c0_48 = arith.constant 0 : index
    %c0_49 = arith.constant 0 : index
    %c0_50 = arith.constant 0 : index
    %c0_51 = arith.constant 0 : index
    %78 = vector.load %arg12[%c0_48, %c0_49, %c0_50, %c0_51] : memref<2x4x8x32xf32, #tpu.memory_space<vmem>>, vector<1x4x8x32xf32>
    %79 = vector.shape_cast %78 : vector<1x4x8x32xf32> to vector<4x8x32xf32>
    "tpu.trace_start"() <{level = 10 : i32, message = "hqe,hed->hqd"}> : () -> ()
    %cst_52 = arith.constant dense<0.000000e+00> : vector<4x8x32xf32>
    %80 = tpu.matmul %77, %79, %cst_52 {dimension_numbers = #tpu.dot_dimension_numbers<[2], [1], [1], [2], [0, 0, 0, 1, 1, 2], [0], [0]>} : vector<4x8x8xf32>, vector<4x8x32xf32>, vector<4x8x32xf32> -> vector<4x8x32xf32>
    "tpu.trace_stop"() : () -> ()
    %cst_53 = arith.constant dense<0.000000e+00> : vector<8x32xf32>
    %81 = vector.multi_reduction <add>, %80, %cst_53 [0] : vector<4x8x32xf32> to vector<8x32xf32>
    %c0_54 = arith.constant 0 : index
    %c0_55 = arith.constant 0 : index
    %c0_56 = arith.constant 0 : index
    %82 = vector.load %arg13[%c0_54, %c0_55, %c0_56] : memref<2x1x32xf32, #tpu.memory_space<vmem>>, vector<1x1x32xf32>
    %83 = vector.shape_cast %82 : vector<1x1x32xf32> to vector<1x32xf32>
    %84 = vector.broadcast %83 : vector<1x32xf32> to vector<8x32xf32>
    %85 = arith.addf %81, %84 : vector<8x32xf32>
    %86 = arith.addf %85, %7 : vector<8x32xf32>
    %c0_57 = arith.constant 0 : index
    %c0_58 = arith.constant 0 : index
    %c0_59 = arith.constant 0 : index
    %87 = vector.load %arg14[%c0_57, %c0_58, %c0_59] : memref<2x1x32xf32, #tpu.memory_space<vmem>>, vector<1x1x32xf32>
    %88 = vector.shape_cast %87 : vector<1x1x32xf32> to vector<1x32xf32>
    %c0_60 = arith.constant 0 : index
    %c0_61 = arith.constant 0 : index
    %c0_62 = arith.constant 0 : index
    %89 = vector.load %arg15[%c0_60, %c0_61, %c0_62] : memref<2x1x32xf32, #tpu.memory_space<vmem>>, vector<1x1x32xf32>
    %90 = vector.shape_cast %89 : vector<1x1x32xf32> to vector<1x32xf32>
    %cst_63 = arith.constant dense<0.000000e+00> : vector<8xf32>
    %91 = vector.multi_reduction <add>, %86, %cst_63 [1] : vector<8x32xf32> to vector<8xf32>
    %92 = vector.shape_cast %91 : vector<8xf32> to vector<8x1xf32>
    %cst_64 = arith.constant 3.200000e+01 : f32
    %93 = vector.broadcast %cst_64 : f32 to vector<8x1xf32>
    %94 = arith.divf %92, %93 : vector<8x1xf32>
    %95 = vector.broadcast %94 : vector<8x1xf32> to vector<8x32xf32>
    %96 = arith.subf %86, %95 : vector<8x32xf32>
    %97 = arith.mulf %96, %96 : vector<8x32xf32>
    %cst_65 = arith.constant dense<0.000000e+00> : vector<8xf32>
    %98 = vector.multi_reduction <add>, %97, %cst_65 [1] : vector<8x32xf32> to vector<8xf32>
    %99 = vector.shape_cast %98 : vector<8xf32> to vector<8x1xf32>
    %cst_66 = arith.constant 3.200000e+01 : f32
    %100 = vector.broadcast %cst_66 : f32 to vector<8x1xf32>
    %101 = arith.divf %99, %100 : vector<8x1xf32>
    %102 = vector.broadcast %94 : vector<8x1xf32> to vector<8x32xf32>
    %103 = arith.subf %86, %102 : vector<8x32xf32>
    %cst_67 = arith.constant 9.99999974E-6 : f32
    %104 = vector.broadcast %cst_67 : f32 to vector<8x1xf32>
    %105 = arith.addf %101, %104 : vector<8x1xf32>
    %106 = math.rsqrt %105 : vector<8x1xf32>
    %107 = vector.broadcast %106 : vector<8x1xf32> to vector<8x32xf32>
    %108 = arith.mulf %103, %107 : vector<8x32xf32>
    %109 = vector.broadcast %88 : vector<1x32xf32> to vector<8x32xf32>
    %110 = arith.mulf %108, %109 : vector<8x32xf32>
    %111 = vector.broadcast %90 : vector<1x32xf32> to vector<8x32xf32>
    %112 = arith.addf %110, %111 : vector<8x32xf32>
    %c0_68 = arith.constant 0 : index
    %c0_69 = arith.constant 0 : index
    %c0_70 = arith.constant 0 : index
    %113 = vector.load %arg16[%c0_68, %c0_69, %c0_70] : memref<2x32x64xf32, #tpu.memory_space<vmem>>, vector<1x32x64xf32>
    %114 = vector.shape_cast %113 : vector<1x32x64xf32> to vector<32x64xf32>
    %cst_71 = arith.constant dense<0.000000e+00> : vector<8x64xf32>
    %115 = tpu.matmul %112, %114, %cst_71 {dimension_numbers = #tpu.dot_dimension_numbers<[1], [0], [0], [1], [0, 0, 1, 1], [], []>} : vector<8x32xf32>, vector<32x64xf32>, vector<8x64xf32> -> vector<8x64xf32>
    %c0_72 = arith.constant 0 : index
    %c0_73 = arith.constant 0 : index
    %c0_74 = arith.constant 0 : index
    %116 = vector.load %arg17[%c0_72, %c0_73, %c0_74] : memref<2x1x64xf32, #tpu.memory_space<vmem>>, vector<1x1x64xf32>
    %117 = vector.shape_cast %116 : vector<1x1x64xf32> to vector<1x64xf32>
    %118 = vector.broadcast %117 : vector<1x64xf32> to vector<8x64xf32>
    %119 = arith.addf %115, %118 : vector<8x64xf32>
    %cst_75 = arith.constant 0.000000e+00 : f32
    %120 = vector.broadcast %cst_75 : f32 to vector<8x64xf32>
    %121 = arith.maximumf %119, %120 : vector<8x64xf32>
    %c0_76 = arith.constant 0 : index
    %c0_77 = arith.constant 0 : index
    %c0_78 = arith.constant 0 : index
    %122 = vector.load %arg18[%c0_76, %c0_77, %c0_78] : memref<2x64x32xf32, #tpu.memory_space<vmem>>, vector<1x64x32xf32>
    %123 = vector.shape_cast %122 : vector<1x64x32xf32> to vector<64x32xf32>
    %cst_79 = arith.constant dense<0.000000e+00> : vector<8x32xf32>
    %124 = tpu.matmul %121, %123, %cst_79 {dimension_numbers = #tpu.dot_dimension_numbers<[1], [0], [0], [1], [0, 0, 1, 1], [], []>} : vector<8x64xf32>, vector<64x32xf32>, vector<8x32xf32> -> vector<8x32xf32>
    %c0_80 = arith.constant 0 : index
    %c0_81 = arith.constant 0 : index
    %c0_82 = arith.constant 0 : index
    %125 = vector.load %arg19[%c0_80, %c0_81, %c0_82] : memref<2x1x32xf32, #tpu.memory_space<vmem>>, vector<1x1x32xf32>
    %126 = vector.shape_cast %125 : vector<1x1x32xf32> to vector<1x32xf32>
    %127 = vector.broadcast %126 : vector<1x32xf32> to vector<8x32xf32>
    %128 = arith.addf %124, %127 : vector<8x32xf32>
    %129 = arith.addf %128, %86 : vector<8x32xf32>
    %c1 = arith.constant 1 : index
    %c0_83 = arith.constant 0 : index
    %c0_84 = arith.constant 0 : index
    %130 = vector.load %arg4[%c1, %c0_83, %c0_84] : memref<2x1x32xf32, #tpu.memory_space<vmem>>, vector<1x1x32xf32>
    %131 = vector.shape_cast %130 : vector<1x1x32xf32> to vector<1x32xf32>
    %c1_85 = arith.constant 1 : index
    %c0_86 = arith.constant 0 : index
    %c0_87 = arith.constant 0 : index
    %132 = vector.load %arg5[%c1_85, %c0_86, %c0_87] : memref<2x1x32xf32, #tpu.memory_space<vmem>>, vector<1x1x32xf32>
    %133 = vector.shape_cast %132 : vector<1x1x32xf32> to vector<1x32xf32>
    %cst_88 = arith.constant dense<0.000000e+00> : vector<8xf32>
    %134 = vector.multi_reduction <add>, %129, %cst_88 [1] : vector<8x32xf32> to vector<8xf32>
    %135 = vector.shape_cast %134 : vector<8xf32> to vector<8x1xf32>
    %cst_89 = arith.constant 3.200000e+01 : f32
    %136 = vector.broadcast %cst_89 : f32 to vector<8x1xf32>
    %137 = arith.divf %135, %136 : vector<8x1xf32>
    %138 = vector.broadcast %137 : vector<8x1xf32> to vector<8x32xf32>
    %139 = arith.subf %129, %138 : vector<8x32xf32>
    %140 = arith.mulf %139, %139 : vector<8x32xf32>
    %cst_90 = arith.constant dense<0.000000e+00> : vector<8xf32>
    %141 = vector.multi_reduction <add>, %140, %cst_90 [1] : vector<8x32xf32> to vector<8xf32>
    %142 = vector.shape_cast %141 : vector<8xf32> to vector<8x1xf32>
    %cst_91 = arith.constant 3.200000e+01 : f32
    %143 = vector.broadcast %cst_91 : f32 to vector<8x1xf32>
    %144 = arith.divf %142, %143 : vector<8x1xf32>
    %145 = vector.broadcast %137 : vector<8x1xf32> to vector<8x32xf32>
    %146 = arith.subf %129, %145 : vector<8x32xf32>
    %cst_92 = arith.constant 9.99999974E-6 : f32
    %147 = vector.broadcast %cst_92 : f32 to vector<8x1xf32>
    %148 = arith.addf %144, %147 : vector<8x1xf32>
    %149 = math.rsqrt %148 : vector<8x1xf32>
    %150 = vector.broadcast %149 : vector<8x1xf32> to vector<8x32xf32>
    %151 = arith.mulf %146, %150 : vector<8x32xf32>
    %152 = vector.broadcast %131 : vector<1x32xf32> to vector<8x32xf32>
    %153 = arith.mulf %151, %152 : vector<8x32xf32>
    %154 = vector.broadcast %133 : vector<1x32xf32> to vector<8x32xf32>
    %155 = arith.addf %153, %154 : vector<8x32xf32>
    %156 = vector.shape_cast %155 : vector<8x32xf32> to vector<1x8x32xf32>
    %157 = vector.shape_cast %156 : vector<1x8x32xf32> to vector<1x8x32xf32>
    %158 = vector.broadcast %157 : vector<1x8x32xf32> to vector<4x8x32xf32>
    %c1_93 = arith.constant 1 : index
    %c0_94 = arith.constant 0 : index
    %c0_95 = arith.constant 0 : index
    %c0_96 = arith.constant 0 : index
    %159 = vector.load %arg6[%c1_93, %c0_94, %c0_95, %c0_96] : memref<2x4x32x8xf32, #tpu.memory_space<vmem>>, vector<1x4x32x8xf32>
    %160 = vector.shape_cast %159 : vector<1x4x32x8xf32> to vector<4x32x8xf32>
    "tpu.trace_start"() <{level = 10 : i32, message = "hsd,hde->hse"}> : () -> ()
    %cst_97 = arith.constant dense<0.000000e+00> : vector<4x8x8xf32>
    %161 = tpu.matmul %158, %160, %cst_97 {dimension_numbers = #tpu.dot_dimension_numbers<[2], [1], [1], [2], [0, 0, 0, 1, 1, 2], [0], [0]>} : vector<4x8x32xf32>, vector<4x32x8xf32>, vector<4x8x8xf32> -> vector<4x8x8xf32>
    "tpu.trace_stop"() : () -> ()
    %c1_98 = arith.constant 1 : index
    %c0_99 = arith.constant 0 : index
    %c0_100 = arith.constant 0 : index
    %c0_101 = arith.constant 0 : index
    %162 = vector.load %arg7[%c1_98, %c0_99, %c0_100, %c0_101] : memref<2x4x1x8xf32, #tpu.memory_space<vmem>>, vector<1x4x1x8xf32>
    %163 = vector.shape_cast %162 : vector<1x4x1x8xf32> to vector<4x1x8xf32>
    %164 = vector.broadcast %163 : vector<4x1x8xf32> to vector<4x8x8xf32>
    %165 = arith.addf %161, %164 : vector<4x8x8xf32>
    %c1_102 = arith.constant 1 : index
    %c0_103 = arith.constant 0 : index
    %c0_104 = arith.constant 0 : index
    %c0_105 = arith.constant 0 : index
    %166 = vector.load %arg8[%c1_102, %c0_103, %c0_104, %c0_105] : memref<2x4x32x8xf32, #tpu.memory_space<vmem>>, vector<1x4x32x8xf32>
    %167 = vector.shape_cast %166 : vector<1x4x32x8xf32> to vector<4x32x8xf32>
    "tpu.trace_start"() <{level = 10 : i32, message = "hsd,hde->hse"}> : () -> ()
    %cst_106 = arith.constant dense<0.000000e+00> : vector<4x8x8xf32>
    %168 = tpu.matmul %158, %167, %cst_106 {dimension_numbers = #tpu.dot_dimension_numbers<[2], [1], [1], [2], [0, 0, 0, 1, 1, 2], [0], [0]>} : vector<4x8x32xf32>, vector<4x32x8xf32>, vector<4x8x8xf32> -> vector<4x8x8xf32>
    "tpu.trace_stop"() : () -> ()
    %c1_107 = arith.constant 1 : index
    %c0_108 = arith.constant 0 : index
    %c0_109 = arith.constant 0 : index
    %c0_110 = arith.constant 0 : index
    %169 = vector.load %arg9[%c1_107, %c0_108, %c0_109, %c0_110] : memref<2x4x1x8xf32, #tpu.memory_space<vmem>>, vector<1x4x1x8xf32>
    %170 = vector.shape_cast %169 : vector<1x4x1x8xf32> to vector<4x1x8xf32>
    %171 = vector.broadcast %170 : vector<4x1x8xf32> to vector<4x8x8xf32>
    %172 = arith.addf %168, %171 : vector<4x8x8xf32>
    %c1_111 = arith.constant 1 : index
    %c0_112 = arith.constant 0 : index
    %c0_113 = arith.constant 0 : index
    %c0_114 = arith.constant 0 : index
    %173 = vector.load %arg10[%c1_111, %c0_112, %c0_113, %c0_114] : memref<2x4x32x8xf32, #tpu.memory_space<vmem>>, vector<1x4x32x8xf32>
    %174 = vector.shape_cast %173 : vector<1x4x32x8xf32> to vector<4x32x8xf32>
    "tpu.trace_start"() <{level = 10 : i32, message = "hsd,hde->hse"}> : () -> ()
    %cst_115 = arith.constant dense<0.000000e+00> : vector<4x8x8xf32>
    %175 = tpu.matmul %158, %174, %cst_115 {dimension_numbers = #tpu.dot_dimension_numbers<[2], [1], [1], [2], [0, 0, 0, 1, 1, 2], [0], [0]>} : vector<4x8x32xf32>, vector<4x32x8xf32>, vector<4x8x8xf32> -> vector<4x8x8xf32>
    "tpu.trace_stop"() : () -> ()
    %c1_116 = arith.constant 1 : index
    %c0_117 = arith.constant 0 : index
    %c0_118 = arith.constant 0 : index
    %c0_119 = arith.constant 0 : index
    %176 = vector.load %arg11[%c1_116, %c0_117, %c0_118, %c0_119] : memref<2x4x1x8xf32, #tpu.memory_space<vmem>>, vector<1x4x1x8xf32>
    %177 = vector.shape_cast %176 : vector<1x4x1x8xf32> to vector<4x1x8xf32>
    %178 = vector.broadcast %177 : vector<4x1x8xf32> to vector<4x8x8xf32>
    %179 = arith.addf %175, %178 : vector<4x8x8xf32>
    "tpu.trace_start"() <{level = 10 : i32, message = "hqe,hke->hqk"}> : () -> ()
    %cst_120 = arith.constant dense<0.000000e+00> : vector<4x8x8xf32>
    %180 = tpu.matmul %165, %172, %cst_120 {dimension_numbers = #tpu.dot_dimension_numbers<[2], [2], [1], [1], [0, 0, 0, 1, 1, 1], [0], [0]>} : vector<4x8x8xf32>, vector<4x8x8xf32>, vector<4x8x8xf32> -> vector<4x8x8xf32>
    "tpu.trace_stop"() : () -> ()
    %cst_121 = arith.constant 0.353553385 : f32
    %181 = vector.broadcast %cst_121 : f32 to vector<4x8x8xf32>
    %182 = arith.mulf %180, %181 : vector<4x8x8xf32>
    %cst_122 = arith.constant -1.000000e+30 : f32
    %183 = vector.shape_cast %10 : vector<1x8x8xi1> to vector<1x8x8xi1>
    %184 = vector.broadcast %183 : vector<1x8x8xi1> to vector<4x8x8xi1>
    %185 = vector.broadcast %cst_122 : f32 to vector<4x8x8xf32>
    %186 = arith.select %184, %182, %185 : vector<4x8x8xi1>, vector<4x8x8xf32>
    %cst_123 = arith.constant dense<0xFF800000> : vector<4x8xf32>
    %187 = vector.multi_reduction <maximumf>, %186, %cst_123 [2] : vector<4x8x8xf32> to vector<4x8xf32>
    %188 = vector.shape_cast %187 : vector<4x8xf32> to vector<4x8x1xf32>
    %189 = vector.broadcast %188 : vector<4x8x1xf32> to vector<4x8x8xf32>
    %190 = arith.subf %186, %189 : vector<4x8x8xf32>
    %191 = math.exp %190 : vector<4x8x8xf32>
    %cst_124 = arith.constant dense<0.000000e+00> : vector<4x8xf32>
    %192 = vector.multi_reduction <add>, %191, %cst_124 [2] : vector<4x8x8xf32> to vector<4x8xf32>
    %193 = vector.shape_cast %192 : vector<4x8xf32> to vector<4x8x1xf32>
    %194 = vector.broadcast %193 : vector<4x8x1xf32> to vector<4x8x8xf32>
    %195 = arith.divf %191, %194 : vector<4x8x8xf32>
    "tpu.trace_start"() <{level = 10 : i32, message = "hqk,hke->hqe"}> : () -> ()
    %cst_125 = arith.constant dense<0.000000e+00> : vector<4x8x8xf32>
    %196 = tpu.matmul %195, %179, %cst_125 {dimension_numbers = #tpu.dot_dimension_numbers<[2], [1], [1], [2], [0, 0, 0, 1, 1, 2], [0], [0]>} : vector<4x8x8xf32>, vector<4x8x8xf32>, vector<4x8x8xf32> -> vector<4x8x8xf32>
    "tpu.trace_stop"() : () -> ()
    %c1_126 = arith.constant 1 : index
    %c0_127 = arith.constant 0 : index
    %c0_128 = arith.constant 0 : index
    %c0_129 = arith.constant 0 : index
    %197 = vector.load %arg12[%c1_126, %c0_127, %c0_128, %c0_129] : memref<2x4x8x32xf32, #tpu.memory_space<vmem>>, vector<1x4x8x32xf32>
    %198 = vector.shape_cast %197 : vector<1x4x8x32xf32> to vector<4x8x32xf32>
    "tpu.trace_start"() <{level = 10 : i32, message = "hqe,hed->hqd"}> : () -> ()
    %cst_130 = arith.constant dense<0.000000e+00> : vector<4x8x32xf32>
    %199 = tpu.matmul %196, %198, %cst_130 {dimension_numbers = #tpu.dot_dimension_numbers<[2], [1], [1], [2], [0, 0, 0, 1, 1, 2], [0], [0]>} : vector<4x8x8xf32>, vector<4x8x32xf32>, vector<4x8x32xf32> -> vector<4x8x32xf32>
    "tpu.trace_stop"() : () -> ()
    %cst_131 = arith.constant dense<0.000000e+00> : vector<8x32xf32>
    %200 = vector.multi_reduction <add>, %199, %cst_131 [0] : vector<4x8x32xf32> to vector<8x32xf32>
    %c1_132 = arith.constant 1 : index
    %c0_133 = arith.constant 0 : index
    %c0_134 = arith.constant 0 : index
    %201 = vector.load %arg13[%c1_132, %c0_133, %c0_134] : memref<2x1x32xf32, #tpu.memory_space<vmem>>, vector<1x1x32xf32>
    %202 = vector.shape_cast %201 : vector<1x1x32xf32> to vector<1x32xf32>
    %203 = vector.broadcast %202 : vector<1x32xf32> to vector<8x32xf32>
    %204 = arith.addf %200, %203 : vector<8x32xf32>
    %205 = arith.addf %204, %129 : vector<8x32xf32>
    %c1_135 = arith.constant 1 : index
    %c0_136 = arith.constant 0 : index
    %c0_137 = arith.constant 0 : index
    %206 = vector.load %arg14[%c1_135, %c0_136, %c0_137] : memref<2x1x32xf32, #tpu.memory_space<vmem>>, vector<1x1x32xf32>
    %207 = vector.shape_cast %206 : vector<1x1x32xf32> to vector<1x32xf32>
    %c1_138 = arith.constant 1 : index
    %c0_139 = arith.constant 0 : index
    %c0_140 = arith.constant 0 : index
    %208 = vector.load %arg15[%c1_138, %c0_139, %c0_140] : memref<2x1x32xf32, #tpu.memory_space<vmem>>, vector<1x1x32xf32>
    %209 = vector.shape_cast %208 : vector<1x1x32xf32> to vector<1x32xf32>
    %cst_141 = arith.constant dense<0.000000e+00> : vector<8xf32>
    %210 = vector.multi_reduction <add>, %205, %cst_141 [1] : vector<8x32xf32> to vector<8xf32>
    %211 = vector.shape_cast %210 : vector<8xf32> to vector<8x1xf32>
    %cst_142 = arith.constant 3.200000e+01 : f32
    %212 = vector.broadcast %cst_142 : f32 to vector<8x1xf32>
    %213 = arith.divf %211, %212 : vector<8x1xf32>
    %214 = vector.broadcast %213 : vector<8x1xf32> to vector<8x32xf32>
    %215 = arith.subf %205, %214 : vector<8x32xf32>
    %216 = arith.mulf %215, %215 : vector<8x32xf32>
    %cst_143 = arith.constant dense<0.000000e+00> : vector<8xf32>
    %217 = vector.multi_reduction <add>, %216, %cst_143 [1] : vector<8x32xf32> to vector<8xf32>
    %218 = vector.shape_cast %217 : vector<8xf32> to vector<8x1xf32>
    %cst_144 = arith.constant 3.200000e+01 : f32
    %219 = vector.broadcast %cst_144 : f32 to vector<8x1xf32>
    %220 = arith.divf %218, %219 : vector<8x1xf32>
    %221 = vector.broadcast %213 : vector<8x1xf32> to vector<8x32xf32>
    %222 = arith.subf %205, %221 : vector<8x32xf32>
    %cst_145 = arith.constant 9.99999974E-6 : f32
    %223 = vector.broadcast %cst_145 : f32 to vector<8x1xf32>
    %224 = arith.addf %220, %223 : vector<8x1xf32>
    %225 = math.rsqrt %224 : vector<8x1xf32>
    %226 = vector.broadcast %225 : vector<8x1xf32> to vector<8x32xf32>
    %227 = arith.mulf %222, %226 : vector<8x32xf32>
    %228 = vector.broadcast %207 : vector<1x32xf32> to vector<8x32xf32>
    %229 = arith.mulf %227, %228 : vector<8x32xf32>
    %230 = vector.broadcast %209 : vector<1x32xf32> to vector<8x32xf32>
    %231 = arith.addf %229, %230 : vector<8x32xf32>
    %c1_146 = arith.constant 1 : index
    %c0_147 = arith.constant 0 : index
    %c0_148 = arith.constant 0 : index
    %232 = vector.load %arg16[%c1_146, %c0_147, %c0_148] : memref<2x32x64xf32, #tpu.memory_space<vmem>>, vector<1x32x64xf32>
    %233 = vector.shape_cast %232 : vector<1x32x64xf32> to vector<32x64xf32>
    %cst_149 = arith.constant dense<0.000000e+00> : vector<8x64xf32>
    %234 = tpu.matmul %231, %233, %cst_149 {dimension_numbers = #tpu.dot_dimension_numbers<[1], [0], [0], [1], [0, 0, 1, 1], [], []>} : vector<8x32xf32>, vector<32x64xf32>, vector<8x64xf32> -> vector<8x64xf32>
    %c1_150 = arith.constant 1 : index
    %c0_151 = arith.constant 0 : index
    %c0_152 = arith.constant 0 : index
    %235 = vector.load %arg17[%c1_150, %c0_151, %c0_152] : memref<2x1x64xf32, #tpu.memory_space<vmem>>, vector<1x1x64xf32>
    %236 = vector.shape_cast %235 : vector<1x1x64xf32> to vector<1x64xf32>
    %237 = vector.broadcast %236 : vector<1x64xf32> to vector<8x64xf32>
    %238 = arith.addf %234, %237 : vector<8x64xf32>
    %cst_153 = arith.constant 0.000000e+00 : f32
    %239 = vector.broadcast %cst_153 : f32 to vector<8x64xf32>
    %240 = arith.maximumf %238, %239 : vector<8x64xf32>
    %c1_154 = arith.constant 1 : index
    %c0_155 = arith.constant 0 : index
    %c0_156 = arith.constant 0 : index
    %241 = vector.load %arg18[%c1_154, %c0_155, %c0_156] : memref<2x64x32xf32, #tpu.memory_space<vmem>>, vector<1x64x32xf32>
    %242 = vector.shape_cast %241 : vector<1x64x32xf32> to vector<64x32xf32>
    %cst_157 = arith.constant dense<0.000000e+00> : vector<8x32xf32>
    %243 = tpu.matmul %240, %242, %cst_157 {dimension_numbers = #tpu.dot_dimension_numbers<[1], [0], [0], [1], [0, 0, 1, 1], [], []>} : vector<8x64xf32>, vector<64x32xf32>, vector<8x32xf32> -> vector<8x32xf32>
    %c1_158 = arith.constant 1 : index
    %c0_159 = arith.constant 0 : index
    %c0_160 = arith.constant 0 : index
    %244 = vector.load %arg19[%c1_158, %c0_159, %c0_160] : memref<2x1x32xf32, #tpu.memory_space<vmem>>, vector<1x1x32xf32>
    %245 = vector.shape_cast %244 : vector<1x1x32xf32> to vector<1x32xf32>
    %246 = vector.broadcast %245 : vector<1x32xf32> to vector<8x32xf32>
    %247 = arith.addf %243, %246 : vector<8x32xf32>
    %248 = arith.addf %247, %205 : vector<8x32xf32>
    %c0_161 = arith.constant 0 : index
    %c0_162 = arith.constant 0 : index
    %249 = vector.load %arg20[%c0_161, %c0_162] : memref<1x32xf32, #tpu.memory_space<vmem>>, vector<1x32xf32>
    %c0_163 = arith.constant 0 : index
    %c0_164 = arith.constant 0 : index
    %250 = vector.load %arg21[%c0_163, %c0_164] : memref<1x32xf32, #tpu.memory_space<vmem>>, vector<1x32xf32>
    %cst_165 = arith.constant dense<0.000000e+00> : vector<8xf32>
    %251 = vector.multi_reduction <add>, %248, %cst_165 [1] : vector<8x32xf32> to vector<8xf32>
    %252 = vector.shape_cast %251 : vector<8xf32> to vector<8x1xf32>
    %cst_166 = arith.constant 3.200000e+01 : f32
    %253 = vector.broadcast %cst_166 : f32 to vector<8x1xf32>
    %254 = arith.divf %252, %253 : vector<8x1xf32>
    %255 = vector.broadcast %254 : vector<8x1xf32> to vector<8x32xf32>
    %256 = arith.subf %248, %255 : vector<8x32xf32>
    %257 = arith.mulf %256, %256 : vector<8x32xf32>
    %cst_167 = arith.constant dense<0.000000e+00> : vector<8xf32>
    %258 = vector.multi_reduction <add>, %257, %cst_167 [1] : vector<8x32xf32> to vector<8xf32>
    %259 = vector.shape_cast %258 : vector<8xf32> to vector<8x1xf32>
    %cst_168 = arith.constant 3.200000e+01 : f32
    %260 = vector.broadcast %cst_168 : f32 to vector<8x1xf32>
    %261 = arith.divf %259, %260 : vector<8x1xf32>
    %262 = vector.broadcast %254 : vector<8x1xf32> to vector<8x32xf32>
    %263 = arith.subf %248, %262 : vector<8x32xf32>
    %cst_169 = arith.constant 9.99999974E-6 : f32
    %264 = vector.broadcast %cst_169 : f32 to vector<8x1xf32>
    %265 = arith.addf %261, %264 : vector<8x1xf32>
    %266 = math.rsqrt %265 : vector<8x1xf32>
    %267 = vector.broadcast %266 : vector<8x1xf32> to vector<8x32xf32>
    %268 = arith.mulf %263, %267 : vector<8x32xf32>
    %269 = vector.broadcast %249 : vector<1x32xf32> to vector<8x32xf32>
    %270 = arith.mulf %268, %269 : vector<8x32xf32>
    %271 = vector.broadcast %250 : vector<1x32xf32> to vector<8x32xf32>
    %272 = arith.addf %270, %271 : vector<8x32xf32>
    %c0_170 = arith.constant 0 : index
    %c0_171 = arith.constant 0 : index
    %c0_172 = arith.constant 0 : index
    %273 = vector.load %arg22[%c0_170, %c0_171, %c0_172] : memref<1x8x32xf32, #tpu.memory_space<vmem>>, vector<1x8x32xf32>
    %274 = vector.shape_cast %273 : vector<1x8x32xf32> to vector<8x32xf32>
    %275 = vector.shape_cast %272 : vector<8x32xf32> to vector<1x8x32xf32>
    tpu.vector_store %arg22[%c0_170, %c0_171, %c0_172], %275 {strides = array<i32>} : memref<1x8x32xf32, #tpu.memory_space<vmem>>, vector<1x8x32xf32>,
    return
  }
  func.func @transform_0(%arg0: i32, %arg1: memref<2xi32, #tpu.memory_space<smem>>) -> (i32, i32, i32) {
    %c0_i32 = arith.constant 0 : i32
    %c0_i32_0 = arith.constant 0 : i32
    %c0_i32_1 = arith.constant 0 : i32
    return %arg0, %c0_i32, %c0_i32_0 : i32, i32, i32
  }
  func.func @transform_1(%arg0: i32, %arg1: memref<2xi32, #tpu.memory_space<smem>>) -> (i32, i32) {
    %c0_i32 = arith.constant 0 : i32
    %c0_i32_0 = arith.constant 0 : i32
    %c0_i32_1 = arith.constant 0 : i32
    return %c0_i32, %c0_i32_0 : i32, i32
  }
  func.func @transform_2(%arg0: i32, %arg1: memref<2xi32, #tpu.memory_space<smem>>) -> (i32, i32, i32) {
    %c0_i32 = arith.constant 0 : i32
    %c0_i32_0 = arith.constant 0 : i32
    %c0_i32_1 = arith.constant 0 : i32
    %c0_i32_2 = arith.constant 0 : i32
    return %c0_i32, %c0_i32_0, %c0_i32_1 : i32, i32, i32
  }
  func.func @transform_3(%arg0: i32, %arg1: memref<2xi32, #tpu.memory_space<smem>>) -> (i32, i32, i32) {
    %c0_i32 = arith.constant 0 : i32
    %c0_i32_0 = arith.constant 0 : i32
    %c0_i32_1 = arith.constant 0 : i32
    %c0_i32_2 = arith.constant 0 : i32
    return %c0_i32, %c0_i32_0, %c0_i32_1 : i32, i32, i32
  }
  func.func @transform_4(%arg0: i32, %arg1: memref<2xi32, #tpu.memory_space<smem>>) -> (i32, i32, i32, i32) {
    %c0_i32 = arith.constant 0 : i32
    %c0_i32_0 = arith.constant 0 : i32
    %c0_i32_1 = arith.constant 0 : i32
    %c0_i32_2 = arith.constant 0 : i32
    %c0_i32_3 = arith.constant 0 : i32
    return %c0_i32, %c0_i32_0, %c0_i32_1, %c0_i32_2 : i32, i32, i32, i32
  }
  func.func @transform_5(%arg0: i32, %arg1: memref<2xi32, #tpu.memory_space<smem>>) -> (i32, i32, i32, i32) {
    %c0_i32 = arith.constant 0 : i32
    %c0_i32_0 = arith.constant 0 : i32
    %c0_i32_1 = arith.constant 0 : i32
    %c0_i32_2 = arith.constant 0 : i32
    %c0_i32_3 = arith.constant 0 : i32
    return %c0_i32, %c0_i32_0, %c0_i32_1, %c0_i32_2 : i32, i32, i32, i32
  }
  func.func @transform_6(%arg0: i32, %arg1: memref<2xi32, #tpu.memory_space<smem>>) -> (i32, i32, i32, i32) {
    %c0_i32 = arith.constant 0 : i32
    %c0_i32_0 = arith.constant 0 : i32
    %c0_i32_1 = arith.constant 0 : i32
    %c0_i32_2 = arith.constant 0 : i32
    %c0_i32_3 = arith.constant 0 : i32
    return %c0_i32, %c0_i32_0, %c0_i32_1, %c0_i32_2 : i32, i32, i32, i32
  }
  func.func @transform_7(%arg0: i32, %arg1: memref<2xi32, #tpu.memory_space<smem>>) -> (i32, i32, i32, i32) {
    %c0_i32 = arith.constant 0 : i32
    %c0_i32_0 = arith.constant 0 : i32
    %c0_i32_1 = arith.constant 0 : i32
    %c0_i32_2 = arith.constant 0 : i32
    %c0_i32_3 = arith.constant 0 : i32
    return %c0_i32, %c0_i32_0, %c0_i32_1, %c0_i32_2 : i32, i32, i32, i32
  }
  func.func @transform_8(%arg0: i32, %arg1: memref<2xi32, #tpu.memory_space<smem>>) -> (i32, i32, i32, i32) {
    %c0_i32 = arith.constant 0 : i32
    %c0_i32_0 = arith.constant 0 : i32
    %c0_i32_1 = arith.constant 0 : i32
    %c0_i32_2 = arith.constant 0 : i32
    %c0_i32_3 = arith.constant 0 : i32
    return %c0_i32, %c0_i32_0, %c0_i32_1, %c0_i32_2 : i32, i32, i32, i32
  }
  func.func @transform_9(%arg0: i32, %arg1: memref<2xi32, #tpu.memory_space<smem>>) -> (i32, i32, i32, i32) {
    %c0_i32 = arith.constant 0 : i32
    %c0_i32_0 = arith.constant 0 : i32
    %c0_i32_1 = arith.constant 0 : i32
    %c0_i32_2 = arith.constant 0 : i32
    %c0_i32_3 = arith.constant 0 : i32
    return %c0_i32, %c0_i32_0, %c0_i32_1, %c0_i32_2 : i32, i32, i32, i32
  }
  func.func @transform_10(%arg0: i32, %arg1: memref<2xi32, #tpu.memory_space<smem>>) -> (i32, i32, i32, i32) {
    %c0_i32 = arith.constant 0 : i32
    %c0_i32_0 = arith.constant 0 : i32
    %c0_i32_1 = arith.constant 0 : i32
    %c0_i32_2 = arith.constant 0 : i32
    %c0_i32_3 = arith.constant 0 : i32
    return %c0_i32, %c0_i32_0, %c0_i32_1, %c0_i32_2 : i32, i32, i32, i32
  }
  func.func @transform_11(%arg0: i32, %arg1: memref<2xi32, #tpu.memory_space<smem>>) -> (i32, i32, i32) {
    %c0_i32 = arith.constant 0 : i32
    %c0_i32_0 = arith.constant 0 : i32
    %c0_i32_1 = arith.constant 0 : i32
    %c0_i32_2 = arith.constant 0 : i32
    return %c0_i32, %c0_i32_0, %c0_i32_1 : i32, i32, i32
  }
  func.func @transform_12(%arg0: i32, %arg1: memref<2xi32, #tpu.memory_space<smem>>) -> (i32, i32, i32) {
    %c0_i32 = arith.constant 0 : i32
    %c0_i32_0 = arith.constant 0 : i32
    %c0_i32_1 = arith.constant 0 : i32
    %c0_i32_2 = arith.constant 0 : i32
    return %c0_i32, %c0_i32_0, %c0_i32_1 : i32, i32, i32
  }
  func.func @transform_13(%arg0: i32, %arg1: memref<2xi32, #tpu.memory_space<smem>>) -> (i32, i32, i32) {
    %c0_i32 = arith.constant 0 : i32
    %c0_i32_0 = arith.constant 0 : i32
    %c0_i32_1 = arith.constant 0 : i32
    %c0_i32_2 = arith.constant 0 : i32
    return %c0_i32, %c0_i32_0, %c0_i32_1 : i32, i32, i32
  }
  func.func @transform_14(%arg0: i32, %arg1: memref<2xi32, #tpu.memory_space<smem>>) -> (i32, i32, i32) {
    %c0_i32 = arith.constant 0 : i32
    %c0_i32_0 = arith.constant 0 : i32
    %c0_i32_1 = arith.constant 0 : i32
    %c0_i32_2 = arith.constant 0 : i32
    return %c0_i32, %c0_i32_0, %c0_i32_1 : i32, i32, i32
  }
  func.func @transform_15(%arg0: i32, %arg1: memref<2xi32, #tpu.memory_space<smem>>) -> (i32, i32, i32) {
    %c0_i32 = arith.constant 0 : i32
    %c0_i32_0 = arith.constant 0 : i32
    %c0_i32_1 = arith.constant 0 : i32
    %c0_i32_2 = arith.constant 0 : i32
    return %c0_i32, %c0_i32_0, %c0_i32_1 : i32, i32, i32
  }
  func.func @transform_16(%arg0: i32, %arg1: memref<2xi32, #tpu.memory_space<smem>>) -> (i32, i32, i32) {
    %c0_i32 = arith.constant 0 : i32
    %c0_i32_0 = arith.constant 0 : i32
    %c0_i32_1 = arith.constant 0 : i32
    %c0_i32_2 = arith.constant 0 : i32
    return %c0_i32, %c0_i32_0, %c0_i32_1 : i32, i32, i32
  }
  func.func @transform_17(%arg0: i32, %arg1: memref<2xi32, #tpu.memory_space<smem>>) -> (i32, i32, i32) {
    %c0_i32 = arith.constant 0 : i32
    %c0_i32_0 = arith.constant 0 : i32
    %c0_i32_1 = arith.constant 0 : i32
    %c0_i32_2 = arith.constant 0 : i32
    return %c0_i32, %c0_i32_0, %c0_i32_1 : i32, i32, i32
  }
  func.func @transform_18(%arg0: i32, %arg1: memref<2xi32, #tpu.memory_space<smem>>) -> (i32, i32) {
    %c0_i32 = arith.constant 0 : i32
    %c0_i32_0 = arith.constant 0 : i32
    %c0_i32_1 = arith.constant 0 : i32
    return %c0_i32, %c0_i32_0 : i32, i32
  }
  func.func @transform_19(%arg0: i32, %arg1: memref<2xi32, #tpu.memory_space<smem>>) -> (i32, i32) {
    %c0_i32 = arith.constant 0 : i32
    %c0_i32_0 = arith.constant 0 : i32
    %c0_i32_1 = arith.constant 0 : i32
    return %c0_i32, %c0_i32_0 : i32, i32
  }
  func.func @transform_20(%arg0: i32, %arg1: memref<2xi32, #tpu.memory_space<smem>>) -> (i32, i32, i32) {
    %c0_i32 = arith.constant 0 : i32
    %c0_i32_0 = arith.constant 0 : i32
    %c0_i32_1 = arith.constant 0 : i32
    return %arg0, %c0_i32, %c0_i32_0 : i32, i32, i32
  }
}

</mosaic_0001>

<bundles_post_ra>
// kernel: encoder_forward.1
= control target key start
LH: loop header
LB: loop body
LE: loop exit
PB: predicated region body
PF: predicated region fallthrough
CT: control target
= control target key end

     0   :  { %s7360_s0 = inlined_call_operand.vmem [shape: s32[2], index: 0, kind: input, shape index: {}]   ;;  %s7361_s1 = inlined_call_operand.vmem [shape: f32[2,8,32], index: 1, kind: input, shape index: {}]   ;;  %s7362_s2 = inlined_call_operand.vmem [shape: f32[8,32], index: 2, kind: input, shape index: {}]   ;;  %s7363_s3 = inlined_call_operand.vmem [shape: f32[2,1,32], index: 3, kind: input, shape index: {}]   ;;  %s7364_s4 = inlined_call_operand.vmem [shape: f32[2,1,32], index: 4, kind: input, shape index: {}]   ;;  %s7365_s5 = inlined_call_operand.vmem [shape: f32[2,4,32,8], index: 5, kind: input, shape index: {}]   ;;  %s7366_s6 = inlined_call_operand.vmem [shape: f32[2,4,1,8], index: 6, kind: input, shape index: {}]   ;;  %s7367_s7 = inlined_call_operand.vmem [shape: f32[2,4,32,8], index: 7, kind: input, shape index: {}]   ;;  %s7368_s8 = inlined_call_operand.vmem [shape: f32[2,4,1,8], index: 8, kind: input, shape index: {}]   ;;  %s7369_s9 = inlined_call_operand.vmem [shape: f32[2,4,32,8], index: 9, kind: input, shape index: {}]   ;;  %s7370_s10 = inlined_call_operand.vmem [shape: f32[2,4,1,8], index: 10, kind: input, shape index: {}]   ;;  %s7371_s11 = inlined_call_operand.vmem [shape: f32[2,4,8,32], index: 11, kind: input, shape index: {}]   ;;  %s7372_s12 = inlined_call_operand.vmem [shape: f32[2,1,32], index: 12, kind: input, shape index: {}]   ;;  %s7373_s13 = inlined_call_operand.vmem [shape: f32[2,1,32], index: 13, kind: input, shape index: {}]   ;;  %s7374_s14 = inlined_call_operand.vmem [shape: f32[2,1,32], index: 14, kind: input, shape index: {}]   ;;  %s7375_s15 = inlined_call_operand.vmem [shape: f32[2,32,64], index: 15, kind: input, shape index: {}]   ;;  %s7376_s16 = inlined_call_operand.vmem [shape: f32[2,1,64], index: 16, kind: input, shape index: {}]   ;;  %s7377_s17 = inlined_call_operand.vmem [shape: f32[2,64,32], index: 17, kind: input, shape index: {}]   ;;  %s7378_s18 = inlined_call_operand.vmem [shape: f32[2,1,32], index: 18, kind: input, shape index: {}]   ;;  %s7379_s19 = inlined_call_operand.vmem [shape: f32[1,32], index: 19, kind: input, shape index: {}]   ;;  %s7380_s20 = inlined_call_operand.vmem [shape: f32[1,32], index: 20, kind: input, shape index: {}]   ;;  %s7381_s21 = inlined_call_operand.hbm [shape: f32[2,8,32], index: 21, kind: output, shape index: {}]  }
   0x1   :  { %7394 = sst [smem:[#allocation14_spill]] %s7360_s0 }
   0x2   :  { %7395 = sst [smem:[#allocation15_spill]] %s7361_s1  ;;  %s7405_s26 = sld [smem:[#allocation14_spill]] }
   0x3   :  { %7396 = sst [smem:[#allocation16_spill]] %s7362_s2 }
   0x4   :  { %7397 = sst [smem:[#allocation17_spill]] %s7363_s3 }
   0x5   :  { %7398 = sst [smem:[#allocation18_spill]] %s7364_s4 }
   0x6   :  { %7399 = sst [smem:[#allocation19_spill]] %s7365_s5 }
   0x7   :  { %7400 = sst [smem:[#allocation20_spill]] %s7366_s6 }
   0x8   :  { %7401 = sst [smem:[#allocation21_spill]] %s7367_s7 }
   0x9   :  { %7402 = sst [smem:[#allocation22_spill]] %s7374_s14  ;;  %s26_s14 = sshll.u32 %s7405_s26, 4  ;;  %s27_s14 = int_to_ptr.vmem [resolvable:$true] %s26_s14 }
   0xa   :  { %7403 = sst [smem:[#allocation23_spill]] %s7380_s20  ;;  %s6198_s27 = scalar_lea.vmem %s27_s14, 16 }
   0xb   :  { %7404 = sst [smem:[#allocation24_spill]] %s7381_s21  ;;  %p6199_p0 = scmp.ne.s32.totalorder %s27_s14, %s6198_s27 }
   0xc   :  { %p6203_p1 = scmp.lt.s32.totalorder %s27_s14, %s27_s14  ;;  %p6204_p2 = scmp.lt.s32.totalorder %s6198_s27, %s6198_s27 }
   0xe   :  { %p6205_p3 = por %p6204_p2, %p6203_p1 }
  0x10   :  { %p6206_p4 = pnand %p6205_p3, %p6199_p0 }
  0x12   :  { %6209 = shalt.err (!%p6206_p4)  }
  0x13   :  { %s6276_s3 = smov [#allocation3]  }
  0x14   :  { %29 = dma.vmem_to_smem %s27_s14, 16, %s6276_s3, [#allocation2] }
  0x15   :  { %6254 = dma.done.wait [#allocation2], 16 }
  0x16   :  { %6255 = vsyncadd [#allocation2], 4294967280 }
  0x17   :  { %31 = sfence }
  0x18   :  { %32 = vsyncpa [#allocation5], 0 }
  0x19   :  { %34 = vsyncpa [#allocation5 + $0x1], 0  ;;  %s6394_s28 = smov 0   ;;  %s6396_s29 = smov 0  }
  0x1a   :  { %s6398_s0 = smov 0   ;;  %s6400_s4 = smov 0  }
  0x1b LB: > { %7406 = sst [smem:[#allocation8_spill]] %s6262_s28  ;;  %s6415_s14 = sadd.s32 4294967295, %s6274_s4   ;;  %s6274_s4 = sphi %s6400_s4, %s7430_s4   ;;  %s6270_s0 = sphi %s6398_s0, %s7432_s0   ;;  %s6266_s29 = sphi %s6396_s29, %s7434_s29   ;;  %s6262_s28 = sphi %s6394_s28, %s7433_s28  }
  0x1c   : > { %7407 = sst [smem:[#allocation9_spill]] %s6270_s0  ;;  %s5100_s30 = sadd.s32 4294967294, %s6274_s4  }
  0x1d   : > { %7408 = sst [smem:[#allocation10_spill]] %s6274_s4  ;;  %s6419_s5 = sadd.s32 1, %s6274_s4  }
  0x1e   : > { %7409 = sst [smem:[#allocation11_spill]] %s6419_s5  ;;  %s472_s22 = sadd.s32 1, %s6270_s0 }
  0x1f   : > { %s469_s23 = ssub.s32 %s6274_s4, %s6419_s5  ;;  %p482_p5 = scmp.ne.s32.totalorder %s6270_s0, %s6266_s29 }
  0x20   : > { %p470_p6 = scmp.eq.s32.totalorder %s469_s23, 0  ;;  %p483_p7 = scmp.eq.s32.totalorder %s6415_s14, 1 }
  0x21   : > { %p488_p8 = scmp.ne.s32.totalorder %s6266_s29, %s6262_s28  ;;  %p489_p9 = scmp.eq.s32.totalorder %s5100_s30, 1 }
  0x22   : > { %s6430_s1 = scalar_select %p470_p6, %s6270_s0, %s472_s22  }
  0x23   : > { %p6432_p10 = por %p483_p7, %p482_p5  ;;  %p6436_p11 = por %p489_p9, %p488_p8 }
  0x24   : > { %7410 = sst [smem:[#allocation12_spill]] %s6430_s1  ;;  %p5103_p12 = scmp.ge.s32.totalorder %s6274_s4, 1 }
  0x25   : > { %s7412_s2 = scalar_select %p6436_p11, 1, 0 }
  0x26   : > { %p571_p13 = scmp.lt.s32.totalorder %s6274_s4, 3 }
  0x27   : > { %7413 = sst [smem:[#allocation13_spill]] %s7412_s2 }
  0x28   : > { %p572_p0 = pnand %p5103_p12, %p571_p13 }
  0x29   : > { %p628_p1 = scmp.lt.s32.totalorder (!%p572_p0), %s6415_s14, 1  ;;  %s7414_s30 = sld [smem:[#allocation15_spill]] (!%p572_p0)  ;;  %vm643_vm0 = vcmask (!%p572_p0), 261120   ;;  %v6277_v15 = vmov (!%p572_p0), 0.0|0.0   ;;  %vm6278_vm1 = vmmov (!%p572_p0), 0   ;;  %v6279_v23 = vmov (!%p572_p0), 0.0  }
  0x2a   : > { %575 = sbr.rel (%p572_p0) target bundleno = 4914 (0x1332), region = 100  ;;  %s7415_s0 = sld [smem:[#allocation16_spill]] (!%p572_p0)  ;;  %5933 = vmatprep.subr.bf16.mxu0 (!%p572_p0), %v6277_v15  ;;  %5939 = vmatprep.subr.bf16.mxu1 (!%p572_p0), %v6277_v15  ;;  %vm1647_vm2 = vcmask (!%p572_p0), 64512   ;;  %vm2739_vm4 = vcmask (!%p572_p0), 523264  }
  0x2b   : > { %s7416_s1 = sld [smem:[#allocation19_spill]] (!%p572_p0)  ;;  %5497 = vmatprep.mubr.msk.f32.mxu0 (!%p572_p0), %vm6278_vm1, %v6279_v23  ;;  %5508 = vmatprep.mubr.msk.f32.mxu1 (!%p572_p0), %vm6278_vm1, %v6279_v23  ;;  %s7420_s7 = sld [smem:[#allocation21_spill]] (!%p572_p0) }
  0x2c   : > { %s7421_s6 = sld [smem:[#allocation20_spill]] (!%p572_p0)  ;;  %s625_s3 = sand.u32 (!%p572_p0), 1, %s6266_s29  }
  0x2d   : > { %s632_s2 = sld [smem:[#allocation3 + %s6415_s14]] (!%p572_p0)  ;;  %s5104_s20 = sshll.u32 (!%p572_p0), %s625_s3, 3 }
  0x2e   : > { %s7425_s4 = sld [smem:[#allocation23_spill]] (!%p572_p0)  ;;  %s5290_s21 = sshll.u32 (!%p572_p0), %s6415_s14, 7 }
  0x30   : > { %v635_v1 = vld [vmem:[%s7415_s0] sm:$0xff] (!%p572_p0)  ;;  %s7417_s0 = sld [smem:[#allocation17_spill]] (!%p572_p0) }
  0x31   : > { %s629_s25 = scalar_select %p628_p1, %s6415_s14, 1  ;;  %v672_v10 = vld [vmem:[%s7416_s1] sm:$0xff]  ;;  %v673_v11 = vld [vmem:[%s7416_s1 + $0x8] sm:$0xff]  ;;  %v674_v17 = vld [vmem:[%s7416_s1 + $0x10] sm:$0xff] }
  0x32   : > { %v676_v12 = vld [vmem:[%s7416_s1 + $0x20] sm:$0xff]  ;;  %v5934_v13 = vpack.c.bf16 %v673_v11, %v672_v10  ;;  %v677_v14 = vld [vmem:[%s7416_s1 + $0x28] sm:$0xff]  ;;  %v675_v18 = vld [vmem:[%s7416_s1 + $0x18] sm:$0xff]  ;;  %s6280_s14 = smov [#allocation4]  }
  0x33   : > { %s5105_s26 = sshll.u32 %s629_s25, 3  ;;  %v5940_v16 = vpack.c.bf16 %v677_v14, %v676_v12  ;;  %v678_v19 = vld [vmem:[%s7416_s1 + $0x30] sm:$0xff]  ;;  %v5937_v20 = vpack.c.bf16 %v675_v18, %v674_v17  ;;  %v679_v21 = vld [vmem:[%s7416_s1 + $0x38] sm:$0xff]  ;;  %v680_v29 = vld [vmem:[%s7416_s1 + $0x40] sm:$0xff]  ;;  %s7424_s25 = sld [smem:[#allocation22_spill]] }
  0x34   : > { %s631_s22 = scalar_lea.vmem %s7414_s30, %s5105_s26  ;;  %5935 = vmatpush3.bf16.msra.mxu0 %v5934_v13  ;;  %v5943_v22 = vpack.c.bf16 %v679_v21, %v678_v19  ;;  %v681_v31 = vld [vmem:[%s7416_s1 + $0x48] sm:$0xff]  ;;  %v684_v32 = vld [vmem:[%s7416_s1 + $0x60] sm:$0xff]  ;;  %s7419_s26 = sld [smem:[#allocation18_spill]]  ;;  %v682_v38 = vld [vmem:[%s7416_s1 + $0x50] sm:$0xff] }
  0x35   : > { %v633_v0 = vld [vmem:[%s631_s22] sm:$0xff]  ;;  %5941 = vmatpush3.bf16.msra.mxu1 %v5940_v16  ;;  %5936 = vmatprep.subr.bf16.mxu0 %v6277_v15  ;;  %v685_v33 = vld [vmem:[%s7416_s1 + $0x68] sm:$0xff]  ;;  %v5946_v36 = vpack.c.bf16 %v681_v31, %v680_v29  ;;  %v683_v40 = vld [vmem:[%s7416_s1 + $0x58] sm:$0xff]  ;;  %s627_s22 = scalar_lea.vmem [#allocation4], %s5104_s20  ;;  %s5028_s30 = scalar_lea.sflag [#allocation5], %s625_s3 }
  0x36   : > { %v634_v2 = vmul.f32 5.656854, %v633_v0  ;;  %5942 = vmatprep.subr.bf16.mxu1 %v6277_v15  ;;  %s7418_s27 = smov %s7417_s0  ;;  %v5106_v28 = vld [vmem:[%s7417_s0] ss:$0 sm:$0xff]  ;;  %v5952_v37 = vpack.c.bf16 %v685_v33, %v684_v32  ;;  %v686_v41 = vld [vmem:[%s7416_s1 + $0x70] sm:$0xff]  ;;  %v687_v42 = vld [vmem:[%s7416_s1 + $0x78] sm:$0xff]  ;;  %v5949_v43 = vpack.c.bf16 %v683_v40, %v682_v38 }
  0x37   : > { %v5955_v44 = vpack.c.bf16 %v687_v42, %v686_v41  ;;  %v999_v45 = vld [vmem:[%s7420_s7] sm:$0xff]  ;;  %v1000_v46 = vld [vmem:[%s7420_s7 + $0x8] sm:$0xff]  ;;  %v1001_v51 = vld [vmem:[%s7420_s7 + $0x10] sm:$0xff]  ;;  %s5041_s23 = sshll.u32 %s627_s22, 4  ;;  %s6214_s20 = sshll.u32 %s6280_s14, 4  ;;  %s7319_s23 = int_to_ptr.vmem [resolvable:$true] %s5041_s23  ;;  %s6215_s20 = int_to_ptr.vmem [resolvable:$false] %s6214_s20 }
  0x38   : > { %v6450_v3 = vadd.f32 %v635_v1, %v634_v2  ;;  %5938 = vmatpush3.bf16.msra.mxu0 %v5937_v20  ;;  %v1003_v47 = vld [vmem:[%s7420_s7 + $0x20] sm:$0xff]  ;;  %v1004_v48 = vld [vmem:[%s7420_s7 + $0x28] sm:$0xff]  ;;  %v5958_v49 = vpack.c.bf16 %v1000_v46, %v999_v45  ;;  %v1002_v52 = vld [vmem:[%s7420_s7 + $0x18] sm:$0xff]  ;;  %s6210_s5 = scalar_lea.vmem %s7319_s23, 128  ;;  %p6217_p5 = scmp.lt.s32.totalorder %s7319_s23, %s6215_s20 }
  0x39   : > { %5944 = vmatpush3.bf16.msra.mxu1 %v5943_v22  ;;  %5945 = vmatprep.subr.bf16.mxu0 %v6277_v15  ;;  %v5964_v50 = vpack.c.bf16 %v1004_v48, %v1003_v47  ;;  %v1005_v53 = vld [vmem:[%s7420_s7 + $0x30] sm:$0xff]  ;;  %v1006_v54 = vld [vmem:[%s7420_s7 + $0x38] sm:$0xff]  ;;  %v5961_v55 = vpack.c.bf16 %v1002_v52, %v1001_v51  ;;  %v1007_v57 = vld [vmem:[%s7420_s7 + $0x40] sm:$0xff]  ;;  %p6211_p2 = scmp.ne.s32.totalorder %s7319_s23, %s6210_s5 }
  0x3a   : > { %v644_v4 = vsel %vm643_vm0, %v6450_v3, 0.0  ;;  %5951 = vmatprep.subr.bf16.mxu1 %v6277_v15  ;;  %v5107_v34 = vld [vmem:[%s7419_s26] ss:$0 sm:$0xff]  ;;  %v5967_v56 = vpack.c.bf16 %v1006_v54, %v1005_v53  ;;  %v1008_v58 = vld [vmem:[%s7420_s7 + $0x48] sm:$0xff]  ;;  %v1009_v63 = vld [vmem:[%s7420_s7 + $0x50] sm:$0xff] }
  0x3b   : > { %645 = vadd.xlane.f32.xlu0 %v644_v4  ;;  %v1011_v59 = vld [vmem:[%s7420_s7 + $0x60] sm:$0xff]  ;;  %v1012_v60 = vld [vmem:[%s7420_s7 + $0x68] sm:$0xff]  ;;  %v5970_v61 = vpack.c.bf16 %v1008_v58, %v1007_v57  ;;  %v1010_v0 = vld [vmem:[%s7420_s7 + $0x58] sm:$0xff]  ;;  %p6212_p3 = pnand %p6211_p2, %p6432_p10 }
  0x3c   : > { %v5976_v62 = vpack.c.bf16 %v1012_v60, %v1011_v59  ;;  %v1013_v1 = vld [vmem:[%s7420_s7 + $0x70] sm:$0xff]  ;;  %v1014_v2 = vld [vmem:[%s7420_s7 + $0x78] sm:$0xff]  ;;  %v5973_v4 = vpack.c.bf16 %v1010_v0, %v1009_v63  ;;  %v1331_v19 = vld [vmem:[%s7369_s9 + $0x40] sm:$0xff] }
  0x3d   : > { %v1325_v12 = vld [vmem:[%s7369_s9 + $0x10] sm:$0xff]  ;;  %v1326_v13 = vld [vmem:[%s7369_s9 + $0x18] sm:$0xff]  ;;  %v1332_v20 = vld [vmem:[%s7369_s9 + $0x48] sm:$0xff]  ;;  %p6213_p4 = pneg %p6212_p3 }
  0x3e   : > { %v1329_v14 = vld [vmem:[%s7369_s9 + $0x30] sm:$0xff]  ;;  %v1330_v16 = vld [vmem:[%s7369_s9 + $0x38] sm:$0xff]  ;;  %v5985_v17 = vpack.c.bf16 %v1326_v13, %v1325_v12  ;;  %v1335_v21 = vld [vmem:[%s7369_s9 + $0x60] sm:$0xff]  ;;  %v637_v13 = vlaneseq }
  0x3f   : > { %v5991_v18 = vpack.c.bf16 %v1330_v16, %v1329_v14  ;;  %v1336_v22 = vld [vmem:[%s7369_s9 + $0x68] sm:$0xff]  ;;  %v1338_v29 = vld [vmem:[%s7369_s9 + $0x78] sm:$0xff]  ;;  %v5116_v41 = vld [vmem:[%s7368_s8] ss:$0 sm:$0xff]  ;;  %v639_v16 = vstv %s632_s2  ;;  %s6216_s2 = scalar_lea.vmem %s6215_s20, 256 }
  0x40   : > { %v5117_v47 = vld [vmem:[%s7368_s8 + $0x1] ss:$0 sm:$0xff]  ;;  %v5118_v51 = vld [vmem:[%s7368_s8 + $0x2] ss:$0 sm:$0xff]  ;;  %v5119_v52 = vld [vmem:[%s7368_s8 + $0x3] ss:$0 sm:$0xff]  ;;  %p6218_p6 = scmp.lt.s32.totalorder %s6216_s2, %s6210_s5 }
  0x41   : > { %v5111_v57 = vld [vmem:[%s7421_s6 + $0x3] ss:$0 sm:$0xff]  ;;  %v5124_v0 = vld [vmem:[%s7370_s10] ss:$0 sm:$0xff]  ;;  %v638_v14 = vand.u32 127, %v637_v13  ;;  %v2299_v13 = vld [vmem:[%s7371_s11 + $0x8] sm:$0xff] }
  0x42   : > { %p6219_p7 = por %p6218_p6, %p6217_p5 }
  0x43   : > { %vm6743_vm3 = vcmp.lt.s32.totalorder %v638_v14, %v639_v16  ;;  %v2300_v14 = vld [vmem:[%s7371_s11 + $0x10] sm:$0xff] }
  0x44   : > { %p6220_p8 = pnand %p6219_p7, %p6213_p4 }
  0xc8   : > { %v646_v5 = vpop.xlane.xlu0 %645 }
  0xc9   : > { %v648_v6 = vmul.f32 0.03125, %v646_v5  ;;  %v5979_v5 = vpack.c.bf16 %v1014_v2, %v1013_v1  ;;  %v5125_v1 = vld [vmem:[%s7370_s10 + $0x1] ss:$0 sm:$0xff] }
  0xcb   : > { %v649_v7 = vsub.f32 %v6450_v3, %v648_v6  ;;  %v1323_v6 = vld [vmem:[%s7369_s9] sm:$0xff] }
  0xcd   : > { %v650_v8 = vmul.f32 %v649_v7, %v649_v7 }
  0xcf   : > { %v651_v9 = vsel %vm643_vm0, %v650_v8, 0.0  ;;  %v1327_v8 = vld [vmem:[%s7369_s9 + $0x20] sm:$0xff] }
  0xd0   : > { %652 = vadd.xlane.f32.xlu0 %v651_v9  ;;  %v1328_v9 = vld [vmem:[%s7369_s9 + $0x28] sm:$0xff] }
  0xd1   : > { %v5988_v11 = vpack.c.bf16 %v1328_v9, %v1327_v8 }
 0x15d   : > { %v653_v24 = vpop.xlane.xlu0 %652 }
 0x15e   : > { %v654_v25 = vmul.f32 0.03125, %v653_v24  ;;  %v5994_v24 = vpack.c.bf16 %v1332_v20, %v1331_v19 }
 0x160   : > { %v655_v26 = vadd.f32 1e-05, %v654_v25  ;;  %v6000_v25 = vpack.c.bf16 %v1336_v22, %v1335_v21 }
 0x162   : > { %6156 = vrsqrt.f32 %v655_v26  ;;  %v1333_v26 = vld [vmem:[%s7369_s9 + $0x50] sm:$0xff] }
 0x16c   : > { %v6157_v27 = vpop.eup %6156 }
 0x16d   : > { %v657_v30 = vmul.f32 %v6157_v27, %v649_v7  ;;  %v1324_v7 = vld [vmem:[%s7369_s9 + $0x8] sm:$0xff]  ;;  %v1334_v27 = vld [vmem:[%s7369_s9 + $0x58] sm:$0xff] }
 0x16e   : > { %v5982_v10 = vpack.c.bf16 %v1324_v7, %v1323_v6 }
 0x16f   : > { %v664_v35 = vmul.f32 %v5106_v28, %v657_v30  ;;  %v1337_v28 = vld [vmem:[%s7369_s9 + $0x70] sm:$0xff]  ;;  %v5997_v30 = vpack.c.bf16 %v1334_v27, %v1333_v26 }
 0x170   : > { %v6003_v31 = vpack.c.bf16 %v1338_v29, %v1337_v28 }
 0x171   : > { %v6511_v39 = vadd.f32 %v5107_v34, %v664_v35 }
 0x173   : > { %5498 = vmatmul.mubr.msk.f32.vlgmr.msra.gmra.mrb[0].mxu0 %vm643_vm0, %v6511_v39  ;;  %5509 = vmatmul.mubr.msk.f32.vlgmr.msra.gmra.mrb[0].mxu1 %vm643_vm0, %v6511_v39 }
 0x174   : > { %5947 = vmatpush3.bf16.msra.mxu0 %v5946_v36  ;;  %5953 = vmatpush3.bf16.msra.mxu1 %v5952_v37 }
 0x175   : > { %5948 = vmatprep.subr.bf16.mxu0 %v6277_v15  ;;  %5954 = vmatprep.subr.bf16.mxu1 %v6277_v15 }
 0x176   : > { %5519 = vmatprep.mubr.msk.f32.mxu0 %vm6278_vm1, %v6279_v23  ;;  %5530 = vmatprep.mubr.msk.f32.mxu1 %vm6278_vm1, %v6279_v23 }
 0x178   : > { %5950 = vmatpush3.bf16.msra.mxu0 %v5949_v43  ;;  %5956 = vmatpush3.bf16.msra.mxu1 %v5955_v44  ;;  %v5108_v43 = vld [vmem:[%s7421_s6] ss:$0 sm:$0xff] }
 0x179   : > { %5957 = vmatprep.subr.bf16.mxu0 %v6277_v15  ;;  %5963 = vmatprep.subr.bf16.mxu1 %v6277_v15 }
 0x17b   : > { %5520 = vmatmul.mubr.msk.f32.vlgmr.msra.gmra.mrb[2].mxu0 %vm643_vm0, %v6511_v39  ;;  %5531 = vmatmul.mubr.msk.f32.vlgmr.msra.gmra.mrb[2].mxu1 %vm643_vm0, %v6511_v39 }
 0x17c   : > { %5959 = vmatpush3.bf16.msra.mxu0 %v5958_v49  ;;  %5965 = vmatpush3.bf16.msra.mxu1 %v5964_v50  ;;  %v5109_v49 = vld [vmem:[%s7421_s6 + $0x1] ss:$0 sm:$0xff] }
 0x17d   : > { %5960 = vmatprep.subr.bf16.mxu0 %v6277_v15  ;;  %5966 = vmatprep.subr.bf16.mxu1 %v6277_v15 }
 0x17e   : > { %5541 = vmatprep.mubr.msk.f32.mxu0 %vm6278_vm1, %v6279_v23  ;;  %5552 = vmatprep.mubr.msk.f32.mxu1 %vm6278_vm1, %v6279_v23 }
 0x180   : > { %5962 = vmatpush3.bf16.msra.mxu0 %v5961_v55  ;;  %5968 = vmatpush3.bf16.msra.mxu1 %v5967_v56  ;;  %v5110_v56 = vld [vmem:[%s7421_s6 + $0x2] ss:$0 sm:$0xff] }
 0x181   : > { %5969 = vmatprep.subr.bf16.mxu0 %v6277_v15  ;;  %5975 = vmatprep.subr.bf16.mxu1 %v6277_v15 }
 0x183   : > { %5542 = vmatmul.mubr.msk.f32.vlgmr.msra.gmra.mrb[4].mxu0 %vm643_vm0, %v6511_v39  ;;  %5553 = vmatmul.mubr.msk.f32.vlgmr.msra.gmra.mrb[4].mxu1 %vm643_vm0, %v6511_v39 }
 0x184   : > { %5971 = vmatpush3.bf16.msra.mxu0 %v5970_v61  ;;  %5977 = vmatpush3.bf16.msra.mxu1 %v5976_v62 }
 0x185   : > { %5972 = vmatprep.subr.bf16.mxu0 %v6277_v15  ;;  %5978 = vmatprep.subr.bf16.mxu1 %v6277_v15 }
 0x186   : > { %5563 = vmatprep.mubr.msk.f32.mxu0 %vm6278_vm1, %v6279_v23  ;;  %5574 = vmatprep.mubr.msk.f32.mxu1 %vm6278_vm1, %v6279_v23 }
 0x188   : > { %5974 = vmatpush3.bf16.msra.mxu0 %v5973_v4  ;;  %5980 = vmatpush3.bf16.msra.mxu1 %v5979_v5 }
 0x189   : > { %5981 = vmatprep.subr.bf16.mxu0 %v6277_v15  ;;  %5987 = vmatprep.subr.bf16.mxu1 %v6277_v15 }
 0x18b   : > { %5564 = vmatmul.mubr.msk.f32.vlgmr.msra.gmra.mrb[6].mxu0 %vm643_vm0, %v6511_v39  ;;  %5575 = vmatmul.mubr.msk.f32.vlgmr.msra.gmra.mrb[6].mxu1 %vm643_vm0, %v6511_v39 }
 0x18c   : > { %5983 = vmatpush3.bf16.msra.mxu0 %v5982_v10  ;;  %5989 = vmatpush3.bf16.msra.mxu1 %v5988_v11 }
 0x18d   : > { %5984 = vmatprep.subr.bf16.mxu0 %v6277_v15  ;;  %5990 = vmatprep.subr.bf16.mxu1 %v6277_v15 }
 0x18e   : > { %5585 = vmatprep.mubr.msk.f32.mxu0 %vm6278_vm1, %v6279_v23  ;;  %5596 = vmatprep.mubr.msk.f32.mxu1 %vm6278_vm1, %v6279_v23 }
 0x190   : > { %5986 = vmatpush3.bf16.msra.mxu0 %v5985_v17  ;;  %5992 = vmatpush3.bf16.msra.mxu1 %v5991_v18 }
 0x191   : > { %5993 = vmatprep.subr.bf16.mxu0 %v6277_v15  ;;  %5999 = vmatprep.subr.bf16.mxu1 %v6277_v15 }
 0x193   : > { %5586 = vmatmul.mubr.msk.f32.vlgmr.msra.gmra.mrb[8].mxu0 %vm643_vm0, %v6511_v39  ;;  %5597 = vmatmul.mubr.msk.f32.vlgmr.msra.gmra.mrb[8].mxu1 %vm643_vm0, %v6511_v39 }
 0x194   : > { %5995 = vmatpush3.bf16.msra.mxu0 %v5994_v24  ;;  %6001 = vmatpush3.bf16.msra.mxu1 %v6000_v25 }
 0x195   : > { %5996 = vmatprep.subr.bf16.mxu0 %v6277_v15  ;;  %6002 = vmatprep.subr.bf16.mxu1 %v6277_v15 }
 0x196   : > { %5607 = vmatprep.mubr.msk.f32.mxu0 %vm6278_vm1, %v6279_v23  ;;  %5618 = vmatprep.mubr.msk.f32.mxu1 %vm6278_vm1, %v6279_v23 }
 0x198   : > { %5998 = vmatpush3.bf16.msra.mxu0 %v5997_v30  ;;  %6004 = vmatpush3.bf16.msra.mxu1 %v6003_v31 }
 0x199   : > { %5621 = vmatprep.subr.mxu0 %v6279_v23  ;;  %5636 = vmatprep.subr.mxu1 %v6279_v23 }
 0x19b   : > { %5608 = vmatmul.mubr.msk.f32.vlgmr.msra.gmra.mrb[10].mxu0 %vm643_vm0, %v6511_v39  ;;  %5619 = vmatmul.mubr.msk.f32.vlgmr.msra.gmra.mrb[10].mxu1 %vm643_vm0, %v6511_v39 }
 0x19c   : > { %5623 = vmatprep.mubr.msk.f32.mxu0 %vm6278_vm1, %v6279_v23  ;;  %5638 = vmatprep.mubr.msk.f32.mxu1 %vm6278_vm1, %v6279_v23 }
 0x246   : > { %v785_v32 = vpop.f32.mrb[0].mxu0  ;;  %v855_v33 = vpop.f32.mrb[0].mxu1 }
 0x247   : > { %v5499_v34 = vpop.f32.mrb[1].mxu0  ;;  %v5510_v35 = vpop.f32.mrb[1].mxu1  ;;  %v786_v48 = vadd.f32 %v5108_v43, %v785_v32  ;;  %v856_v53 = vadd.f32 %v5109_v49, %v855_v33 }
 0x24e   : > { %v925_v36 = vpop.f32.mrb[2].mxu0  ;;  %v995_v37 = vpop.f32.mrb[2].mxu1 }
 0x24f   : > { %v5521_v38 = vpop.f32.mrb[3].mxu0  ;;  %v5532_v40 = vpop.f32.mrb[3].mxu1  ;;  %v926_v62 = vadd.f32 %v5110_v56, %v925_v36  ;;  %v996_v63 = vadd.f32 %v5111_v57, %v995_v37 }
 0x256   : > { %v1109_v42 = vpop.f32.mrb[4].mxu0  ;;  %v1179_v39 = vpop.f32.mrb[4].mxu1 }
 0x257   : > { %v1110_v44 = vadd.f32 %v5116_v41, %v1109_v42  ;;  %v5543_v45 = vpop.f32.mrb[5].mxu0  ;;  %v5554_v46 = vpop.f32.mrb[5].mxu1  ;;  %v1180_v50 = vadd.f32 %v5117_v47, %v1179_v39 }
 0x259   : > { %5622 = vmatpush3.xpose.msk.msra.mxu0 %vm1647_vm2, %v1110_v44 }
 0x25a   : > { %5626 = vmatprep.subr.mxu0 %v6279_v23 }
 0x25c   : > { %5624 = vmatmul.mubr.msk.f32.vlgmr.msra.gmra.mrb[12].mxu0 %vm1647_vm2, %v786_v48 }
 0x25d   : > { %5627 = vmatpush3.xpose.msk.msra.mxu0 %vm1647_vm2, %v1180_v50  ;;  %5628 = vmatprep.mubr.msk.f32.mxu0 %vm6278_vm1, %v6279_v23 }
 0x25e   : > { %v1249_v54 = vpop.f32.mrb[6].mxu0  ;;  %v1319_v55 = vpop.f32.mrb[6].mxu1  ;;  %5631 = vmatprep.subr.mxu0 %v6279_v23 }
 0x25f   : > { %v1250_v58 = vadd.f32 %v5118_v51, %v1249_v54  ;;  %v1320_v59 = vadd.f32 %v5119_v52, %v1319_v55  ;;  %v5565_v60 = vpop.f32.mrb[7].mxu0  ;;  %v5576_v61 = vpop.f32.mrb[7].mxu1 }
 0x260   : > { %5629 = vmatmul.mubr.msk.f32.vlgmr.msra.gmra.mrb[14].mxu0 %vm1647_vm2, %v856_v53 }
 0x261   : > { %5632 = vmatpush3.xpose.msk.msra.mxu0 %vm1647_vm2, %v1250_v58  ;;  %5637 = vmatpush3.xpose.msk.msra.mxu1 %vm1647_vm2, %v1320_v59 }
 0x262   : > { %5633 = vmatprep.mubr.msk.f32.mxu0 %vm6278_vm1, %v6279_v23  ;;  %5641 = vmatprep.subr.mxu0 %v6279_v23 }
 0x263   : > { %5646 = vmatprep.subr.mxu1 %v6279_v23 }
 0x264   : > { %5634 = vmatmul.mubr.msk.f32.vlgmr.msra.gmra.mrb[16].mxu0 %vm1647_vm2, %v926_v62  ;;  %5639 = vmatmul.mubr.msk.f32.vlgmr.msra.gmra.mrb[12].mxu1 %vm1647_vm2, %v996_v63  ;;  %v5126_v63 = vld [vmem:[%s7370_s10 + $0x2] ss:$0 sm:$0xff] }
 0x265   : > { %5643 = vmatprep.mubr.msk.f32.mxu0 %vm6278_vm1, %v6279_v23  ;;  %5648 = vmatprep.mubr.msk.f32.mxu1 %vm6278_vm1, %v6279_v23 }
 0x266   : > { %v1433_v2 = vpop.f32.mrb[8].mxu0  ;;  %v1503_v4 = vpop.f32.mrb[8].mxu1 }
 0x267   : > { %v1434_v5 = vadd.f32 %v5124_v0, %v1433_v2  ;;  %v1504_v6 = vadd.f32 %v5125_v1, %v1503_v4  ;;  %v5587_v7 = vpop.f32.mrb[9].mxu0  ;;  %v5598_v8 = vpop.f32.mrb[9].mxu1  ;;  %v5127_v4 = vld [vmem:[%s7370_s10 + $0x3] ss:$0 sm:$0xff] }
 0x269   : > { %5642 = vmatpush3.msra.mxu0 %v1434_v5  ;;  %5647 = vmatpush3.msra.mxu1 %v1504_v6 }
 0x26a   : > { %5651 = vmatprep.subr.mxu0 %v6279_v23  ;;  %5656 = vmatprep.subr.mxu1 %v6279_v23 }
 0x26e   : > { %v6738_v9 = vpop.f32.mrb[10].mxu0  ;;  %v6740_v10 = vpop.f32.mrb[10].mxu1 }
 0x26f   : > { %v5609_v11 = vpop.f32.mrb[11].mxu0  ;;  %v5620_v12 = vpop.f32.mrb[11].mxu1  ;;  %v1574_v2 = vadd.f32 %v5126_v63, %v6738_v9  ;;  %v1644_v7 = vadd.f32 %v5127_v4, %v6740_v10  ;;  %v2298_v10 = vld [vmem:[%s7371_s11] sm:$0xff]  ;;  %v2729_v63 = vld [vmem:[%s7377_s17 + $0x28] sm:$0xff] }
 0x32f   : > { %v1720_v17 = vpop.f32.mrb[12].mxu0 }
 0x330   : > { %v1952_v19 = vmul.f32 0.35355338, %v1720_v17  ;;  %v5625_v20 = vpop.f32.mrb[13].mxu0 }
 0x332   : > { %v1958_v21 = vsel %vm6743_vm3, %v1952_v19, -1e+30  ;;  %v2301_v19 = vld [vmem:[%s7371_s11 + $0x18] sm:$0xff] }
 0x333   : > { %v1796_v22 = vpop.f32.mrb[14].mxu0  ;;  %v1962_v24 = vsel %vm1647_vm2, %v1958_v21, -inf }
 0x334   : > { %v1953_v25 = vmul.f32 0.35355338, %v1796_v22  ;;  %1963 = vmax.xlane.f32.xlu1 %v1962_v24  ;;  %v5630_v26 = vpop.f32.mrb[15].mxu0 }
 0x336   : > { %v1959_v27 = vsel %vm6743_vm3, %v1953_v25, -1e+30 }
 0x337   : > { %v1872_v28 = vpop.f32.mrb[16].mxu0  ;;  %v1948_v29 = vpop.f32.mrb[12].mxu1  ;;  %v1965_v30 = vsel %vm1647_vm2, %v1959_v27, -inf }
 0x338   : > { %v1954_v31 = vmul.f32 0.35355338, %v1872_v28  ;;  %v1955_v32 = vmul.f32 0.35355338, %v1948_v29  ;;  %v5640_v33 = vpop.f32.mrb[13].mxu1  ;;  %1966 = vmax.xlane.f32.xlu1 %v1965_v30  ;;  %v5635_v34 = vpop.f32.mrb[17].mxu0 }
 0x33a   : > { %v1961_v35 = vsel %vm6743_vm3, %v1955_v32, -1e+30  ;;  %v1960_v36 = vsel %vm6743_vm3, %v1954_v31, -1e+30 }
 0x33b   : > { %v1971_v37 = vsel %vm1647_vm2, %v1961_v35, -inf  ;;  %v1968_v38 = vsel %vm1647_vm2, %v1960_v36, -inf }
 0x33c   : > { %1972 = vmax.xlane.f32.xlu1 %v1971_v37  ;;  %1969 = vmax.xlane.f32.xlu0 %v1968_v38 }
 0x3c1   : > { %v1964_v40 = vpop.xlane.xlu1 %1963 }
 0x3c2   : > { %v1974_v41 = vsub.f32 %v1958_v21, %v1964_v40 }
 0x3c4   : > { %v1978_v42 = vmul.f32 1.442695, %v1974_v41 }
 0x3c5   : > { %v1967_v39 = vpop.xlane.xlu1 %1966 }
 0x3c6   : > { %6158 = vpow2.f32 %v1978_v42  ;;  %v1975_v43 = vsub.f32 %v1959_v27, %v1967_v39  ;;  %v5148_v42 = vld [vmem:[%s7372_s12] ss:$0 sm:$0xff] }
 0x3c8   : > { %v1980_v44 = vmul.f32 1.442695, %v1975_v43 }
 0x3c9   : > { %v1973_v45 = vpop.xlane.xlu1 %1972  ;;  %v1970_v46 = vpop.xlane.xlu0 %1969 }
 0x3ca   : > { %6160 = vpow2.f32 %v1980_v44  ;;  %v1977_v47 = vsub.f32 %v1961_v35, %v1973_v45  ;;  %v1976_v48 = vsub.f32 %v1960_v36, %v1970_v46 }
 0x3cc   : > { %v1984_v49 = vmul.f32 1.442695, %v1977_v47  ;;  %v1982_v50 = vmul.f32 1.442695, %v1976_v48 }
 0x3ce   : > { %6162 = vpow2.f32 %v1984_v49 }
 0x3cf   : > { %6164 = vpow2.f32 %v1982_v50 }
 0x3d0   : > { %v6159_v51 = vpop.eup %6158 }
 0x3d1   : > { %v1986_v52 = vsel %vm1647_vm2, %v6159_v51, 0.0 }
 0x3d2   : > { %1987 = vadd.xlane.f32.xlu0 %v1986_v52 }
 0x3d4   : > { %v6161_v53 = vpop.eup %6160 }
 0x3d5   : > { %v1989_v54 = vsel %vm1647_vm2, %v6161_v53, 0.0 }
 0x3d6   : > { %1990 = vadd.xlane.f32.xlu1 %v1989_v54  ;;  %v2642_v54 = vld [vmem:[%s7375_s15 + $0x18] sm:$0xff] }
 0x3d8   : > { %v6163_v55 = vpop.eup %6162 }
 0x3d9   : > { %v6165_v56 = vpop.eup %6164  ;;  %v1995_v57 = vsel %vm1647_vm2, %v6163_v55, 0.0 }
 0x3da   : > { %1996 = vadd.xlane.f32.xlu1 %v1995_v57  ;;  %v1992_v58 = vsel %vm1647_vm2, %v6165_v56, 0.0  ;;  %v2725_v57 = vld [vmem:[%s7377_s17 + $0x8] sm:$0xff] }
 0x3db   : > { %1993 = vadd.xlane.f32.xlu0 %v1992_v58  ;;  %v2726_v58 = vld [vmem:[%s7377_s17 + $0x10] sm:$0xff] }
 0x45f   : > { %v1988_v59 = vpop.xlane.xlu0 %1987 }
 0x460   : > { %6166 = vrcp.f32 %v1988_v59 }
 0x463   : > { %v1991_v60 = vpop.xlane.xlu1 %1990 }
 0x464   : > { %6168 = vrcp.f32 %v1991_v60  ;;  %v2727_v60 = vld [vmem:[%s7377_s17 + $0x18] sm:$0xff] }
 0x467   : > { %v1997_v61 = vpop.xlane.xlu1 %1996 }
 0x468   : > { %6170 = vrcp.f32 %v1997_v61  ;;  %v1994_v62 = vpop.xlane.xlu0 %1993  ;;  %v6015_v61 = vpack.c.bf16 %v2727_v60, %v2726_v58  ;;  %v5165_v58 = vld [vmem:[%s7416_s1 + $0xb0] sm:$0xff]  ;;  %v5166_v60 = vld [vmem:[%s7416_s1 + $0xb8] sm:$0xff] }
 0x469   : > { %6172 = vrcp.f32 %v1994_v62  ;;  %v2728_v62 = vld [vmem:[%s7377_s17 + $0x20] sm:$0xff] }
 0x46a   : > { %v6167_v0 = vpop.eup %6166 }
 0x46b   : > { %v1999_v1 = vmul.f32 %v6167_v0, %v6159_v51  ;;  %v2639_v51 = vld [vmem:[%s7375_s15] sm:$0xff]  ;;  %v6018_v0 = vpack.c.bf16 %v2729_v63, %v2728_v62  ;;  %v5190_v62 = vld [vmem:[%s7420_s7 + $0x98] sm:$0xff]  ;;  %v6033_v63 = vpack.c.bf16 %v5166_v60, %v5165_v58 }
 0x46d   : > { %5644 = vmatmul.mubr.msk.f32.vlgmr.msra.gmra.mrb[18].mxu0 %vm1647_vm2, %v1999_v1 }
 0x46e   : > { %v6169_v5 = vpop.eup %6168  ;;  %5652 = vmatpush3.msra.mxu0 %v1574_v2  ;;  %5653 = vmatprep.mubr.msk.f32.mxu0 %vm6278_vm1, %v6279_v23 }
 0x46f   : > { %v2001_v6 = vmul.f32 %v6169_v5, %v6161_v53  ;;  %5661 = vmatprep.subr.mxu0 %v6279_v23  ;;  %v2641_v53 = vld [vmem:[%s7375_s15 + $0x10] sm:$0xff] }
 0x471   : > { %5649 = vmatmul.mubr.msk.f32.vlgmr.msra.gmra.mrb[14].mxu1 %vm1647_vm2, %v2001_v6  ;;  %v5149_v6 = vld [vmem:[%s7373_s13] ss:$0 sm:$0xff] }
 0x472   : > { %v6171_v8 = vpop.eup %6170  ;;  %5657 = vmatpush3.msra.mxu1 %v1644_v7  ;;  %5658 = vmatprep.mubr.msk.f32.mxu1 %vm6278_vm1, %v6279_v23 }
 0x473   : > { %v6173_v9 = vpop.eup %6172  ;;  %v2005_v11 = vmul.f32 %v6171_v8, %v6163_v55  ;;  %5666 = vmatprep.subr.mxu1 %v6279_v23  ;;  %v6009_v55 = vpack.c.bf16 %v2642_v54, %v2641_v53  ;;  %v5150_v8 = vld [vmem:[%s7424_s25] ss:$0 sm:$0xff]  ;;  %v5188_v53 = vld [vmem:[%s7420_s7 + $0x88] sm:$0xff]  ;;  %v5158_v54 = vld [vmem:[%s7419_s26 + $0x1] ss:$0 sm:$0xff] }
 0x474   : > { %v2003_v12 = vmul.f32 %v6173_v9, %v6165_v56  ;;  %v2724_v56 = vld [vmem:[%s7377_s17] sm:$0xff] }
 0x475   : > { %5659 = vmatmul.mubr.msk.f32.vlgmr.msra.gmra.mrb[16].mxu1 %vm1647_vm2, %v2005_v11  ;;  %v6012_v59 = vpack.c.bf16 %v2725_v57, %v2724_v56 }
 0x476   : > { %5654 = vmatmul.mubr.msk.f32.vlgmr.msra.gmra.mrb[20].mxu0 %vm1647_vm2, %v2003_v12  ;;  %5668 = vmatprep.mubr.msk.f32.mxu1 %vm6278_vm1, %v6279_v23  ;;  %v2730_v12 = vld [vmem:[%s7377_s17 + $0x30] sm:$0xff] }
 0x477   : > { %5663 = vmatprep.mubr.msk.f32.mxu0 %vm6278_vm1, %v6279_v23  ;;  %5662 = vmatpush3.msra.mxu0 %v2298_v10  ;;  %v2731_v10 = vld [vmem:[%s7377_s17 + $0x38] sm:$0xff] }
 0x478   : > { %5671 = vmatprep.subr.mxu0 %v6279_v23  ;;  %5667 = vmatpush3.msra.mxu1 %v2299_v13  ;;  %v6021_v13 = vpack.c.bf16 %v2731_v10, %v2730_v12  ;;  %v5198_v12 = vld [vmem:[%s7420_s7 + $0xd8] sm:$0xff] }
 0x479   : > { %5676 = vmatprep.subr.mxu1 %v6279_v23 }
 0x540   : > { %v2075_v16 = vpop.f32.mrb[18].mxu0 }
 0x541   : > { %v5645_v17 = vpop.f32.mrb[19].mxu0  ;;  %5664 = vmatmul.mubr.msk.f32.vlgmr.msra.gmra.mrb[22].mxu0 %vm1647_vm2, %v2075_v16 }
 0x542   : > { %5672 = vmatpush3.msra.mxu0 %v2300_v14  ;;  %5673 = vmatprep.mubr.msk.f32.mxu0 %vm6278_vm1, %v6279_v23  ;;  %v5151_v14 = vld [vmem:[%s7376_s16] ss:$0 sm:$0xff] }
 0x543   : > { %6005 = vmatprep.subr.bf16.mxu0 %v6277_v15 }
 0x544   : > { %v2148_v20 = vpop.f32.mrb[14].mxu1 }
 0x545   : > { %v5650_v21 = vpop.f32.mrb[15].mxu1  ;;  %5669 = vmatmul.mubr.msk.f32.vlgmr.msra.gmra.mrb[18].mxu1 %vm1647_vm2, %v2148_v20 }
 0x546   : > { %5677 = vmatpush3.msra.mxu1 %v2301_v19  ;;  %5678 = vmatprep.mubr.msk.f32.mxu1 %vm6278_vm1, %v6279_v23  ;;  %v5153_v21 = vld [vmem:[%s7378_s18] ss:$0 sm:$0xff] }
 0x547   : > { %6011 = vmatprep.subr.bf16.mxu1 %v6277_v15 }
 0x548   : > { %v2294_v22 = vpop.f32.mrb[16].mxu1 }
 0x549   : > { %v2221_v24 = vpop.f32.mrb[20].mxu0  ;;  %v5660_v25 = vpop.f32.mrb[17].mxu1  ;;  %5679 = vmatmul.mubr.msk.f32.vlgmr.msra.gmra.mrb[20].mxu1 %vm1647_vm2, %v2294_v22 }
 0x54a   : > { %v5655_v26 = vpop.f32.mrb[21].mxu0  ;;  %5674 = vmatmul.mubr.msk.f32.vlgmr.msra.gmra.mrb[24].mxu0 %vm1647_vm2, %v2221_v24  ;;  %5708 = vmatprep.mubr.msk.f32.mxu1 %vm6278_vm1, %v6279_v23 }
 0x54b   : > { %5689 = vmatprep.mubr.msk.f32.mxu0 %vm6278_vm1, %v6279_v23  ;;  %6013 = vmatpush3.bf16.msra.mxu1 %v6012_v59 }
 0x54c   : > { %6014 = vmatprep.subr.bf16.mxu1 %v6277_v15 }
 0x54f   : > { %6016 = vmatpush3.bf16.msra.mxu1 %v6015_v61  ;;  %v5189_v61 = vld [vmem:[%s7420_s7 + $0x90] sm:$0xff] }
 0x550   : > { %6017 = vmatprep.subr.bf16.mxu1 %v6277_v15 }
 0x553   : > { %6019 = vmatpush3.bf16.msra.mxu1 %v6018_v0  ;;  %v6051_v0 = vpack.c.bf16 %v5190_v62, %v5189_v61  ;;  %v5179_v61 = vld [vmem:[%s7421_s6 + $0x4] ss:$0 sm:$0xff] }
 0x554   : > { %6020 = vmatprep.subr.bf16.mxu1 %v6277_v15 }
 0x557   : > { %6022 = vmatpush3.bf16.msra.mxu1 %v6021_v13 }
 0x558   : > { %6035 = vmatprep.subr.bf16.mxu1 %v6277_v15 }
 0x614   : > { %v2371_v27 = vpop.f32.mrb[22].mxu0 }
 0x615   : > { %v5665_v28 = vpop.f32.mrb[23].mxu0  ;;  %v2594_v30 = vsel %vm643_vm0, %v2371_v27, 0.0 }
 0x618   : > { %v2444_v29 = vpop.f32.mrb[18].mxu1 }
 0x619   : > { %v2595_v31 = vsel %vm643_vm0, %v2444_v29, 0.0  ;;  %v5670_v32 = vpop.f32.mrb[19].mxu1 }
 0x61a   : > { %v2596_v33 = vadd.f32 %v2595_v31, %v2594_v30 }
 0x61c   : > { %v2590_v34 = vpop.f32.mrb[20].mxu1 }
 0x61d   : > { %v2517_v35 = vpop.f32.mrb[24].mxu0  ;;  %v5680_v36 = vpop.f32.mrb[21].mxu1  ;;  %v2599_v41 = vsel %vm643_vm0, %v2590_v34, 0.0  ;;  %v5160_v34 = vld [vmem:[%s7416_s1 + $0x88] sm:$0xff] }
 0x61e   : > { %v2597_v37 = vsel %vm643_vm0, %v2517_v35, 0.0  ;;  %v5675_v38 = vpop.f32.mrb[25].mxu0  ;;  %v5167_v35 = vld [vmem:[%s7416_s1 + $0xc0] sm:$0xff] }
 0x61f   : > { %v2598_v40 = vadd.f32 %v2597_v37, %v2596_v33  ;;  %v5159_v33 = vld [vmem:[%s7416_s1 + $0x80] sm:$0xff]  ;;  %v5168_v37 = vld [vmem:[%s7416_s1 + $0xc8] sm:$0xff] }
 0x620   : > { %v6024_v36 = vpack.c.bf16 %v5160_v34, %v5159_v33  ;;  %v6036_v38 = vpack.c.bf16 %v5168_v37, %v5167_v35  ;;  %v5224_v33 = vld [vmem:[%s7369_s9 + $0xc8] sm:$0xff]  ;;  %v5202_v37 = vld [vmem:[%s7420_s7 + $0xf8] sm:$0xff] }
 0x621   : > { %v2600_v39 = vadd.f32 %v2599_v41, %v2598_v40  ;;  %v5161_v40 = vld [vmem:[%s7416_s1 + $0x90] sm:$0xff]  ;;  %v5162_v41 = vld [vmem:[%s7416_s1 + $0x98] sm:$0xff] }
 0x623   : > { %v2608_v43 = vadd.f32 %v5148_v42, %v2600_v39  ;;  %v5169_v42 = vld [vmem:[%s7416_s1 + $0xd0] sm:$0xff]  ;;  %v6027_v39 = vpack.c.bf16 %v5162_v41, %v5161_v40  ;;  %v5226_v40 = vld [vmem:[%s7369_s9 + $0xd8] sm:$0xff] }
 0x625   : > { %v6821_v44 = vadd.f32 %v2608_v43, %v6450_v3  ;;  %v2640_v3 = vld [vmem:[%s7375_s15 + $0x8] sm:$0xff]  ;;  %v5170_v43 = vld [vmem:[%s7416_s1 + $0xd8] sm:$0xff] }
 0x626   : > { %v6006_v52 = vpack.c.bf16 %v2640_v3, %v2639_v51  ;;  %v5164_v3 = vld [vmem:[%s7416_s1 + $0xa8] sm:$0xff] }
 0x627   : > { %v2612_v45 = vsel %vm643_vm0, %v6821_v44, 0.0 }
 0x628   : > { %2613 = vadd.xlane.f32.xlu0 %v2612_v45  ;;  %6007 = vmatpush3.bf16.msra.mxu0 %v6006_v52  ;;  %v5187_v52 = vld [vmem:[%s7420_s7 + $0x80] sm:$0xff] }
 0x629   : > { %6008 = vmatprep.subr.bf16.mxu0 %v6277_v15  ;;  %v6048_v57 = vpack.c.bf16 %v5188_v53, %v5187_v52 }
 0x62c   : > { %6010 = vmatpush3.bf16.msra.mxu0 %v6009_v55 }
 0x62d   : > { %6023 = vmatprep.subr.bf16.mxu0 %v6277_v15 }
 0x6b5   : > { %v2614_v46 = vpop.xlane.xlu0 %2613 }
 0x6b6   : > { %v2615_v47 = vmul.f32 0.03125, %v2614_v46 }
 0x6b8   : > { %v2616_v48 = vsub.f32 %v6821_v44, %v2615_v47 }
 0x6ba   : > { %v2617_v49 = vmul.f32 %v2616_v48, %v2616_v48 }
 0x6bc   : > { %v2618_v50 = vsel %vm643_vm0, %v2617_v49, 0.0  ;;  %v5157_v49 = vld [vmem:[%s7418_s27 + $0x1] ss:$0 sm:$0xff] }
 0x6bd   : > { %2619 = vadd.xlane.f32.xlu1 %v2618_v50  ;;  %v5163_v50 = vld [vmem:[%s7416_s1 + $0xa0] sm:$0xff] }
 0x6be   : > { %v6030_v56 = vpack.c.bf16 %v5164_v3, %v5163_v50  ;;  %v5230_v3 = vld [vmem:[%s7369_s9 + $0xf8] sm:$0xff] }
 0x74a   : > { %v2620_v1 = vpop.xlane.xlu1 %2619 }
 0x74b   : > { %v2621_v2 = vmul.f32 0.03125, %v2620_v1  ;;  %v5171_v1 = vld [vmem:[%s7416_s1 + $0xe0] sm:$0xff] }
 0x74d   : > { %v2622_v4 = vadd.f32 1e-05, %v2621_v2  ;;  %v5172_v2 = vld [vmem:[%s7416_s1 + $0xe8] sm:$0xff] }
 0x74f   : > { %6174 = vrsqrt.f32 %v2622_v4  ;;  %v5195_v4 = vld [vmem:[%s7420_s7 + $0xc0] sm:$0xff] }
 0x759   : > { %v6175_v5 = vpop.eup %6174 }
 0x75a   : > { %v2624_v7 = vmul.f32 %v6175_v5, %v2616_v48  ;;  %v5196_v5 = vld [vmem:[%s7420_s7 + $0xc8] sm:$0xff] }
 0x75c   : > { %v2631_v9 = vmul.f32 %v5149_v6, %v2624_v7  ;;  %v6042_v6 = vpack.c.bf16 %v5172_v2, %v5171_v1  ;;  %v6060_v7 = vpack.c.bf16 %v5196_v5, %v5195_v4  ;;  %v5209_v1 = vld [vmem:[%s7368_s8 + $0x6] ss:$0 sm:$0xff] }
 0x75d   : > { %v5181_v5 = vld [vmem:[%s7421_s6 + $0x6] ss:$0 sm:$0xff] }
 0x75e   : > { %v2638_v11 = vadd.f32 %v5150_v8, %v2631_v9  ;;  %v5173_v8 = vld [vmem:[%s7416_s1 + $0xf0] sm:$0xff]  ;;  %v5174_v9 = vld [vmem:[%s7416_s1 + $0xf8] sm:$0xff] }
 0x75f   : > { %v6045_v10 = vpack.c.bf16 %v5174_v9, %v5173_v8 }
 0x760   : > { %5690 = vmatmul.mubr.msk.f32.vlgmr.msra.gmra.mrb[26].mxu0 %vm643_vm0, %v2638_v11  ;;  %v5197_v11 = vld [vmem:[%s7420_s7 + $0xd0] sm:$0xff] }
 0x761   : > { %5719 = vmatprep.mubr.msk.f32.mxu0 %vm6278_vm1, %v6279_v23  ;;  %6025 = vmatpush3.bf16.msra.mxu0 %v6024_v36  ;;  %v6063_v13 = vpack.c.bf16 %v5198_v12, %v5197_v11  ;;  %v5201_v36 = vld [vmem:[%s7420_s7 + $0xf0] sm:$0xff]  ;;  %v5208_v11 = vld [vmem:[%s7368_s8 + $0x5] ss:$0 sm:$0xff]  ;;  %v5235_v12 = vld [vmem:[%s7370_s10 + $0x4] ss:$0 sm:$0xff] }
 0x762   : > { %6026 = vmatprep.subr.bf16.mxu0 %v6277_v15  ;;  %v6069_v41 = vpack.c.bf16 %v5202_v37, %v5201_v36 }
 0x765   : > { %6028 = vmatpush3.bf16.msra.mxu0 %v6027_v39  ;;  %v5219_v39 = vld [vmem:[%s7369_s9 + $0xa0] sm:$0xff] }
 0x766   : > { %6029 = vmatprep.subr.bf16.mxu0 %v6277_v15 }
 0x833   : > { %v2719_v16 = vpop.f32.mrb[26].mxu0 }
 0x834   : > { %v2720_v17 = vadd.f32 %v5151_v14, %v2719_v16  ;;  %v5691_v19 = vpop.f32.mrb[27].mxu0  ;;  %v5191_v14 = vld [vmem:[%s7420_s7 + $0xa0] sm:$0xff]  ;;  %v5192_v16 = vld [vmem:[%s7420_s7 + $0xa8] sm:$0xff] }
 0x835   : > { %v5216_v19 = vld [vmem:[%s7369_s9 + $0x88] sm:$0xff] }
 0x836   : > { %v2723_v20 = vmax.f32 %v2720_v17, 0.0  ;;  %v5215_v17 = vld [vmem:[%s7369_s9 + $0x80] sm:$0xff] }
 0x838   : > { %5709 = vmatmul.mubr.msk.f32.vlgmr.msra.gmra.mrb[22].mxu1 %vm2739_vm4, %v2723_v20  ;;  %v6054_v20 = vpack.c.bf16 %v5192_v16, %v5191_v14  ;;  %v5180_v14 = vld [vmem:[%s7421_s6 + $0x5] ss:$0 sm:$0xff] }
 0x839   : > { %5741 = vmatprep.mubr.msk.f32.mxu1 %vm6278_vm1, %v6279_v23  ;;  %6037 = vmatpush3.bf16.msra.mxu1 %v6036_v38  ;;  %v5225_v38 = vld [vmem:[%s7369_s9 + $0xd0] sm:$0xff] }
 0x83a   : > { %6038 = vmatprep.subr.bf16.mxu1 %v6277_v15 }
 0x90b   : > { %v2809_v22 = vpop.f32.mrb[22].mxu1 }
 0x90c   : > { %v2810_v24 = vadd.f32 %v5153_v21, %v2809_v22  ;;  %v5710_v25 = vpop.f32.mrb[23].mxu1  ;;  %v6072_v21 = vpack.c.bf16 %v5216_v19, %v5215_v17  ;;  %v5193_v22 = vld [vmem:[%s7420_s7 + $0xb0] sm:$0xff] }
 0x90d   : > { %v5217_v25 = vld [vmem:[%s7369_s9 + $0x90] sm:$0xff] }
 0x90e   : > { %v6888_v26 = vadd.f32 %v2810_v24, %v6821_v44  ;;  %v6039_v44 = vpack.c.bf16 %v5170_v43, %v5169_v42  ;;  %v5194_v24 = vld [vmem:[%s7420_s7 + $0xb8] sm:$0xff]  ;;  %v6087_v42 = vpack.c.bf16 %v5226_v40, %v5225_v38  ;;  %v5220_v43 = vld [vmem:[%s7369_s9 + $0xa8] sm:$0xff] }
 0x910   : > { %v2818_v27 = vsel %vm643_vm0, %v6888_v26, 0.0  ;;  %6040 = vmatpush3.bf16.msra.mxu1 %v6039_v44  ;;  %v6078_v44 = vpack.c.bf16 %v5220_v43, %v5219_v39 }
 0x911   : > { %2819 = vadd.xlane.f32.xlu0 %v2818_v27  ;;  %6047 = vmatprep.subr.bf16.mxu1 %v6277_v15  ;;  %v5218_v27 = vld [vmem:[%s7369_s9 + $0x98] sm:$0xff] }
 0x99e   : > { %v2820_v28 = vpop.xlane.xlu0 %2819 }
 0x99f   : > { %v2821_v29 = vmul.f32 0.03125, %v2820_v28  ;;  %v6057_v28 = vpack.c.bf16 %v5194_v24, %v5193_v22  ;;  %v5210_v22 = vld [vmem:[%s7368_s8 + $0x7] ss:$0 sm:$0xff] }
 0x9a1   : > { %v2822_v30 = vsub.f32 %v6888_v26, %v2821_v29  ;;  %v6075_v29 = vpack.c.bf16 %v5218_v27, %v5217_v25  ;;  %v5182_v27 = vld [vmem:[%s7421_s6 + $0x7] ss:$0 sm:$0xff]  ;;  %s7426_s6 = sld [smem:[#allocation24_spill]] }
 0x9a3   : > { %v2823_v31 = vmul.f32 %v2822_v30, %v2822_v30 }
 0x9a5   : > { %v2824_v32 = vsel %vm643_vm0, %v2823_v31, 0.0  ;;  %v5200_v31 = vld [vmem:[%s7420_s7 + $0xe8] sm:$0xff] }
 0x9a6   : > { %2825 = vadd.xlane.f32.xlu1 %v2824_v32  ;;  %v5223_v32 = vld [vmem:[%s7369_s9 + $0xc0] sm:$0xff] }
 0x9a7   : > { %v6084_v35 = vpack.c.bf16 %v5224_v33, %v5223_v32  ;;  %v5236_v32 = vld [vmem:[%s7370_s10 + $0x5] ss:$0 sm:$0xff] }
 0xa33   : > { %v2826_v45 = vpop.xlane.xlu1 %2825 }
 0xa34   : > { %v2827_v46 = vmul.f32 0.03125, %v2826_v45  ;;  %v5221_v45 = vld [vmem:[%s7369_s9 + $0xb0] sm:$0xff] }
 0xa36   : > { %v2828_v47 = vadd.f32 1e-05, %v2827_v46  ;;  %v5222_v46 = vld [vmem:[%s7369_s9 + $0xb8] sm:$0xff] }
 0xa38   : > { %6176 = vrsqrt.f32 %v2828_v47  ;;  %v6081_v47 = vpack.c.bf16 %v5222_v46, %v5221_v45 }
 0xa42   : > { %v6177_v48 = vpop.eup %6176 }
 0xa43   : > { %v2830_v51 = vmul.f32 %v6177_v48, %v2822_v30  ;;  %v5199_v30 = vld [vmem:[%s7420_s7 + $0xe0] sm:$0xff]  ;;  %s7317_s7 = scalar_lea.hbm %s7426_s6, %s5290_s21 }
 0xa44   : > { %v6066_v34 = vpack.c.bf16 %v5200_v31, %v5199_v30  ;;  %v5227_v48 = vld [vmem:[%s7369_s9 + $0xe0] sm:$0xff] }
 0xa45   : > { %v2837_v55 = vmul.f32 %v5157_v49, %v2830_v51  ;;  %v5228_v49 = vld [vmem:[%s7369_s9 + $0xe8] sm:$0xff]  ;;  %v5229_v51 = vld [vmem:[%s7369_s9 + $0xf0] sm:$0xff] }
 0xa46   : > { %v6090_v50 = vpack.c.bf16 %v5228_v49, %v5227_v48  ;;  %v6093_v52 = vpack.c.bf16 %v5230_v3, %v5229_v51 }
 0xa47   : > { %v6943_v59 = vadd.f32 %v5158_v54, %v2837_v55 }
 0xa49   : > { %5720 = vmatmul.mubr.msk.f32.vlgmr.msra.gmra.mrb[28].mxu0 %vm643_vm0, %v6943_v59  ;;  %5742 = vmatmul.mubr.msk.f32.vlgmr.msra.gmra.mrb[24].mxu1 %vm643_vm0, %v6943_v59 }
 0xa4a   : > { %6031 = vmatpush3.bf16.msra.mxu0 %v6030_v56  ;;  %6049 = vmatpush3.bf16.msra.mxu1 %v6048_v57  ;;  %v5207_v57 = vld [vmem:[%s7368_s8 + $0x4] ss:$0 sm:$0xff] }
 0xa4b   : > { %6032 = vmatprep.subr.bf16.mxu0 %v6277_v15  ;;  %6050 = vmatprep.subr.bf16.mxu1 %v6277_v15 }
 0xa4c   : > { %5730 = vmatprep.mubr.msk.f32.mxu0 %vm6278_vm1, %v6279_v23  ;;  %5763 = vmatprep.mubr.msk.f32.mxu1 %vm6278_vm1, %v6279_v23 }
 0xa4e   : > { %6034 = vmatpush3.bf16.msra.mxu0 %v6033_v63  ;;  %6052 = vmatpush3.bf16.msra.mxu1 %v6051_v0 }
 0xa4f   : > { %6041 = vmatprep.subr.bf16.mxu0 %v6277_v15  ;;  %6059 = vmatprep.subr.bf16.mxu1 %v6277_v15 }
 0xa51   : > { %5731 = vmatmul.mubr.msk.f32.vlgmr.msra.gmra.mrb[30].mxu0 %vm643_vm0, %v6943_v59  ;;  %5764 = vmatmul.mubr.msk.f32.vlgmr.msra.gmra.mrb[26].mxu1 %vm643_vm0, %v6943_v59 }
 0xa52   : > { %6043 = vmatpush3.bf16.msra.mxu0 %v6042_v6  ;;  %6061 = vmatpush3.bf16.msra.mxu1 %v6060_v7 }
 0xa53   : > { %6044 = vmatprep.subr.bf16.mxu0 %v6277_v15  ;;  %6062 = vmatprep.subr.bf16.mxu1 %v6277_v15 }
 0xa54   : > { %5752 = vmatprep.mubr.msk.f32.mxu0 %vm6278_vm1, %v6279_v23  ;;  %5785 = vmatprep.mubr.msk.f32.mxu1 %vm6278_vm1, %v6279_v23 }
 0xa56   : > { %6046 = vmatpush3.bf16.msra.mxu0 %v6045_v10  ;;  %6064 = vmatpush3.bf16.msra.mxu1 %v6063_v13 }
 0xa57   : > { %6053 = vmatprep.subr.bf16.mxu0 %v6277_v15  ;;  %6071 = vmatprep.subr.bf16.mxu1 %v6277_v15 }
 0xa59   : > { %5753 = vmatmul.mubr.msk.f32.vlgmr.msra.gmra.mrb[32].mxu0 %vm643_vm0, %v6943_v59  ;;  %5786 = vmatmul.mubr.msk.f32.vlgmr.msra.gmra.mrb[28].mxu1 %vm643_vm0, %v6943_v59 }
 0xa5a   : > { %6055 = vmatpush3.bf16.msra.mxu0 %v6054_v20  ;;  %6073 = vmatpush3.bf16.msra.mxu1 %v6072_v21 }
 0xa5b   : > { %6056 = vmatprep.subr.bf16.mxu0 %v6277_v15  ;;  %6074 = vmatprep.subr.bf16.mxu1 %v6277_v15 }
 0xa5c   : > { %5774 = vmatprep.mubr.msk.f32.mxu0 %vm6278_vm1, %v6279_v23  ;;  %5807 = vmatprep.mubr.msk.f32.mxu1 %vm6278_vm1, %v6279_v23 }
 0xa5e   : > { %6058 = vmatpush3.bf16.msra.mxu0 %v6057_v28  ;;  %6076 = vmatpush3.bf16.msra.mxu1 %v6075_v29 }
 0xa5f   : > { %6065 = vmatprep.subr.bf16.mxu0 %v6277_v15  ;;  %6083 = vmatprep.subr.bf16.mxu1 %v6277_v15 }
 0xa61   : > { %5775 = vmatmul.mubr.msk.f32.vlgmr.msra.gmra.mrb[34].mxu0 %vm643_vm0, %v6943_v59  ;;  %5808 = vmatmul.mubr.msk.f32.vlgmr.msra.gmra.mrb[30].mxu1 %vm643_vm0, %v6943_v59 }
 0xa62   : > { %6067 = vmatpush3.bf16.msra.mxu0 %v6066_v34  ;;  %6085 = vmatpush3.bf16.msra.mxu1 %v6084_v35 }
 0xa63   : > { %6068 = vmatprep.subr.bf16.mxu0 %v6277_v15  ;;  %6086 = vmatprep.subr.bf16.mxu1 %v6277_v15 }
 0xa64   : > { %5796 = vmatprep.mubr.msk.f32.mxu0 %vm6278_vm1, %v6279_v23  ;;  %5829 = vmatprep.mubr.msk.f32.mxu1 %vm6278_vm1, %v6279_v23 }
 0xa66   : > { %6070 = vmatpush3.bf16.msra.mxu0 %v6069_v41  ;;  %6088 = vmatpush3.bf16.msra.mxu1 %v6087_v42 }
 0xa67   : > { %6077 = vmatprep.subr.bf16.mxu0 %v6277_v15  ;;  %5843 = vmatprep.subr.mxu1 %v6279_v23 }
 0xa69   : > { %5797 = vmatmul.mubr.msk.f32.vlgmr.msra.gmra.mrb[36].mxu0 %vm643_vm0, %v6943_v59  ;;  %5830 = vmatmul.mubr.msk.f32.vlgmr.msra.gmra.mrb[32].mxu1 %vm643_vm0, %v6943_v59 }
 0xa6a   : > { %6079 = vmatpush3.bf16.msra.mxu0 %v6078_v44  ;;  %5818 = vmatprep.mubr.msk.f32.mxu0 %vm6278_vm1, %v6279_v23 }
 0xa6b   : > { %6080 = vmatprep.subr.bf16.mxu0 %v6277_v15  ;;  %5845 = vmatprep.mubr.msk.f32.mxu1 %vm6278_vm1, %v6279_v23 }
 0xa6e   : > { %6082 = vmatpush3.bf16.msra.mxu0 %v6081_v47 }
 0xa6f   : > { %6089 = vmatprep.subr.bf16.mxu0 %v6277_v15 }
 0xa71   : > { %5819 = vmatmul.mubr.msk.f32.vlgmr.msra.gmra.mrb[38].mxu0 %vm643_vm0, %v6943_v59 }
 0xa72   : > { %6091 = vmatpush3.bf16.msra.mxu0 %v6090_v50  ;;  %5840 = vmatprep.mubr.msk.f32.mxu0 %vm6278_vm1, %v6279_v23 }
 0xa73   : > { %6092 = vmatprep.subr.bf16.mxu0 %v6277_v15 }
 0xa76   : > { %6094 = vmatpush3.bf16.msra.mxu0 %v6093_v52 }
 0xa77   : > { %5853 = vmatprep.subr.mxu0 %v6279_v23 }
 0xa79   : > { %5841 = vmatmul.mubr.msk.f32.vlgmr.msra.gmra.mrb[40].mxu0 %vm643_vm0, %v6943_v59 }
 0xa7a   : > { %5855 = vmatprep.mubr.msk.f32.mxu0 %vm6278_vm1, %v6279_v23 }
 0xb1c   : > { %v2960_v53 = vpop.f32.mrb[28].mxu0  ;;  %v3100_v54 = vpop.f32.mrb[24].mxu1 }
 0xb1d   : > { %v5721_v55 = vpop.f32.mrb[29].mxu0  ;;  %v5743_v56 = vpop.f32.mrb[25].mxu1  ;;  %v2961_v0 = vadd.f32 %v5179_v61, %v2960_v53  ;;  %v3101_v9 = vadd.f32 %v5181_v5, %v3100_v54 }
 0xb24   : > { %v3030_v58 = vpop.f32.mrb[30].mxu0  ;;  %v3286_v60 = vpop.f32.mrb[26].mxu1 }
 0xb25   : > { %v3287_v62 = vadd.f32 %v5207_v57, %v3286_v60  ;;  %v5732_v63 = vpop.f32.mrb[31].mxu0  ;;  %v5765_v59 = vpop.f32.mrb[27].mxu1  ;;  %v3031_v21 = vadd.f32 %v5180_v14, %v3030_v58 }
 0xb27   : > { %5844 = vmatpush3.xpose.msk.msra.mxu1 %vm1647_vm2, %v3287_v62 }
 0xb28   : > { %5848 = vmatprep.subr.mxu1 %v6279_v23 }
 0xb2a   : > { %5846 = vmatmul.mubr.msk.f32.vlgmr.msra.gmra.mrb[34].mxu1 %vm1647_vm2, %v2961_v0 }
 0xb2b   : > { %5850 = vmatprep.mubr.msk.f32.mxu1 %vm6278_vm1, %v6279_v23 }
 0xb2c   : > { %v3170_v2 = vpop.f32.mrb[32].mxu0  ;;  %v3426_v4 = vpop.f32.mrb[28].mxu1 }
 0xb2d   : > { %v3427_v6 = vadd.f32 %v5209_v1, %v3426_v4  ;;  %v5754_v7 = vpop.f32.mrb[33].mxu0  ;;  %v5787_v8 = vpop.f32.mrb[29].mxu1  ;;  %v3171_v31 = vadd.f32 %v5182_v27, %v3170_v2 }
 0xb2f   : > { %5854 = vmatpush3.xpose.msk.msra.mxu0 %vm1647_vm2, %v3427_v6 }
 0xb30   : > { %5863 = vmatprep.subr.mxu0 %v6279_v23 }
 0xb32   : > { %5856 = vmatmul.mubr.msk.f32.vlgmr.msra.gmra.mrb[42].mxu0 %vm1647_vm2, %v3101_v9 }
 0xb33   : > { %5865 = vmatprep.mubr.msk.f32.mxu0 %vm6278_vm1, %v6279_v23 }
 0xb34   : > { %v3356_v10 = vpop.f32.mrb[34].mxu0  ;;  %v3612_v13 = vpop.f32.mrb[30].mxu1 }
 0xb35   : > { %v3357_v16 = vadd.f32 %v5208_v11, %v3356_v10  ;;  %v3613_v17 = vadd.f32 %v5235_v12, %v3612_v13  ;;  %v5776_v19 = vpop.f32.mrb[35].mxu0  ;;  %v5809_v20 = vpop.f32.mrb[31].mxu1 }
 0xb37   : > { %5849 = vmatpush3.xpose.msk.msra.mxu1 %vm1647_vm2, %v3357_v16  ;;  %5864 = vmatpush3.msra.mxu0 %v3613_v17  ;;  %v5237_v16 = vld [vmem:[%s7370_s10 + $0x6] ss:$0 sm:$0xff] }
 0xb38   : > { %5858 = vmatprep.subr.mxu1 %v6279_v23  ;;  %5873 = vmatprep.subr.mxu0 %v6279_v23 }
 0xb3a   : > { %5851 = vmatmul.mubr.msk.f32.vlgmr.msra.gmra.mrb[36].mxu1 %vm1647_vm2, %v3031_v21 }
 0xb3b   : > { %5860 = vmatprep.mubr.msk.f32.mxu1 %vm6278_vm1, %v6279_v23 }
 0xb3c   : > { %v3496_v24 = vpop.f32.mrb[36].mxu0  ;;  %v7158_v25 = vpop.f32.mrb[32].mxu1 }
 0xb3d   : > { %v3497_v28 = vadd.f32 %v5210_v22, %v3496_v24  ;;  %v5798_v29 = vpop.f32.mrb[37].mxu0  ;;  %v5831_v30 = vpop.f32.mrb[33].mxu1  ;;  %v3753_v20 = vadd.f32 %v5237_v16, %v7158_v25  ;;  %v5238_v25 = vld [vmem:[%s7370_s10 + $0x7] ss:$0 sm:$0xff]  ;;  %v5281_v16 = vld [vmem:[%s7377_s17 + $0x68] sm:$0xff] }
 0xb3f   : > { %5859 = vmatpush3.xpose.msk.msra.mxu1 %vm1647_vm2, %v3497_v28 }
 0xb40   : > { %5868 = vmatprep.subr.mxu1 %v6279_v23 }
 0xb42   : > { %5861 = vmatmul.mubr.msk.f32.vlgmr.msra.gmra.mrb[38].mxu1 %vm1647_vm2, %v3171_v31 }
 0xb43   : > { %5870 = vmatprep.mubr.msk.f32.mxu1 %vm6278_vm1, %v6279_v23 }
 0xb44   : > { %v3682_v33 = vpop.f32.mrb[38].mxu0 }
 0xb45   : > { %v3683_v34 = vadd.f32 %v5236_v32, %v3682_v33  ;;  %v5820_v35 = vpop.f32.mrb[39].mxu0  ;;  %v5255_v33 = vld [vmem:[%s7371_s11 + $0x20] sm:$0xff] }
 0xb46   : > { %v5257_v35 = vld [vmem:[%s7371_s11 + $0x30] sm:$0xff] }
 0xb47   : > { %5869 = vmatpush3.msra.mxu1 %v3683_v34  ;;  %v5256_v34 = vld [vmem:[%s7371_s11 + $0x28] sm:$0xff] }
 0xb48   : > { %5878 = vmatprep.subr.mxu1 %v6279_v23 }
 0xb4c   : > { %v7172_v36 = vpop.f32.mrb[40].mxu0 }
 0xb4d   : > { %v5842_v37 = vpop.f32.mrb[41].mxu0  ;;  %v3823_v30 = vadd.f32 %v5238_v25, %v7172_v36  ;;  %v5268_v25 = vld [vmem:[%s7424_s25 + $0x1] ss:$0 sm:$0xff] }
 0xbfd   : > { %v3898_v38 = vpop.f32.mrb[34].mxu1 }
 0xbfe   : > { %v4130_v40 = vmul.f32 0.35355338, %v3898_v38  ;;  %v5847_v41 = vpop.f32.mrb[35].mxu1 }
 0xbff   : > { %v5258_v41 = vld [vmem:[%s7371_s11 + $0x38] sm:$0xff] }
 0xc00   : > { %v4134_v42 = vsel %vm6743_vm3, %v4130_v40, -1e+30 }
 0xc01   : > { %v4138_v39 = vsel %vm1647_vm2, %v4134_v42, -inf }
 0xc02   : > { %4139 = vmax.xlane.f32.xlu0 %v4138_v39 }
 0xc05   : > { %v4050_v43 = vpop.f32.mrb[42].mxu0 }
 0xc06   : > { %v4132_v44 = vmul.f32 0.35355338, %v4050_v43  ;;  %v5857_v45 = vpop.f32.mrb[43].mxu0 }
 0xc08   : > { %v4136_v46 = vsel %vm6743_vm3, %v4132_v44, -1e+30 }
 0xc09   : > { %v4144_v47 = vsel %vm1647_vm2, %v4136_v46, -inf }
 0xc0a   : > { %4145 = vmax.xlane.f32.xlu0 %v4144_v47 }
 0xc0d   : > { %v3974_v48 = vpop.f32.mrb[36].mxu1 }
 0xc0e   : > { %v4131_v49 = vmul.f32 0.35355338, %v3974_v48  ;;  %v5852_v50 = vpop.f32.mrb[37].mxu1 }
 0xc10   : > { %v4135_v51 = vsel %vm6743_vm3, %v4131_v49, -1e+30 }
 0xc11   : > { %v4141_v3 = vsel %vm1647_vm2, %v4135_v51, -inf }
 0xc12   : > { %4142 = vmax.xlane.f32.xlu1 %v4141_v3 }
 0xc15   : > { %v4126_v52 = vpop.f32.mrb[38].mxu1 }
 0xc16   : > { %v4133_v53 = vmul.f32 0.35355338, %v4126_v52  ;;  %v5862_v54 = vpop.f32.mrb[39].mxu1 }
 0xc18   : > { %v4137_v55 = vsel %vm6743_vm3, %v4133_v53, -1e+30 }
 0xc19   : > { %v4147_v56 = vsel %vm1647_vm2, %v4137_v55, -inf }
 0xc1a   : > { %4148 = vmax.xlane.f32.xlu1 %v4147_v56 }
 0xc8f   : > { %v4140_v57 = vpop.xlane.xlu0 %4139 }
 0xc90   : > { %v4150_v58 = vsub.f32 %v4134_v42, %v4140_v57 }
 0xc92   : > { %v4154_v60 = vmul.f32 1.442695, %v4150_v58 }
 0xc94   : > { %6178 = vpow2.f32 %v4154_v60 }
 0xc97   : > { %v4146_v61 = vpop.xlane.xlu0 %4145 }
 0xc98   : > { %v4152_v62 = vsub.f32 %v4136_v46, %v4146_v61 }
 0xc9a   : > { %v4158_v63 = vmul.f32 1.442695, %v4152_v62 }
 0xc9c   : > { %6180 = vpow2.f32 %v4158_v63 }
 0xc9e   : > { %v6179_v59 = vpop.eup %6178 }
 0xc9f   : > { %v4143_v0 = vpop.xlane.xlu1 %4142  ;;  %v4162_v1 = vsel %vm1647_vm2, %v6179_v59, 0.0 }
 0xca0   : > { %v4151_v2 = vsub.f32 %v4135_v51, %v4143_v0  ;;  %4163 = vadd.xlane.f32.xlu0 %v4162_v1 }
 0xca2   : > { %v4156_v4 = vmul.f32 1.442695, %v4151_v2 }
 0xca4   : > { %6182 = vpow2.f32 %v4156_v4  ;;  %v5269_v4 = vld [vmem:[%s7375_s15 + $0x20] sm:$0xff] }
 0xca6   : > { %v6181_v18 = vpop.eup %6180 }
 0xca7   : > { %v4149_v5 = vpop.xlane.xlu1 %4148  ;;  %v4168_v6 = vsel %vm1647_vm2, %v6181_v18, 0.0 }
 0xca8   : > { %v4153_v7 = vsub.f32 %v4137_v55, %v4149_v5  ;;  %4169 = vadd.xlane.f32.xlu0 %v4168_v6  ;;  %v5272_v6 = vld [vmem:[%s7375_s15 + $0x38] sm:$0xff] }
 0xcaa   : > { %v4160_v8 = vmul.f32 1.442695, %v4153_v7 }
 0xcac   : > { %6184 = vpow2.f32 %v4160_v8  ;;  %v5276_v8 = vld [vmem:[%s7377_s17 + $0x40] sm:$0xff] }
 0xcae   : > { %v6183_v9 = vpop.eup %6182 }
 0xcaf   : > { %v4165_v11 = vsel %vm1647_vm2, %v6183_v9, 0.0 }
 0xcb0   : > { %4166 = vadd.xlane.f32.xlu1 %v4165_v11  ;;  %v5278_v11 = vld [vmem:[%s7377_s17 + $0x50] sm:$0xff] }
 0xcb6   : > { %v6185_v12 = vpop.eup %6184 }
 0xcb7   : > { %v4171_v10 = vsel %vm1647_vm2, %v6185_v12, 0.0 }
 0xcb8   : > { %4172 = vadd.xlane.f32.xlu1 %v4171_v10  ;;  %v5279_v10 = vld [vmem:[%s7377_s17 + $0x58] sm:$0xff] }
 0xd2d   : > { %v4164_v13 = vpop.xlane.xlu0 %4163 }
 0xd2e   : > { %6186 = vrcp.f32 %v4164_v13  ;;  %v6105_v13 = vpack.c.bf16 %v5279_v10, %v5278_v11 }
 0xd35   : > { %v4170_v14 = vpop.xlane.xlu0 %4169 }
 0xd36   : > { %6188 = vrcp.f32 %v4170_v14  ;;  %v5280_v14 = vld [vmem:[%s7377_s17 + $0x60] sm:$0xff] }
 0xd38   : > { %v6187_v17 = vpop.eup %6186 }
 0xd39   : > { %v4175_v19 = vmul.f32 %v6187_v17, %v6179_v59  ;;  %v6108_v17 = vpack.c.bf16 %v5281_v16, %v5280_v14 }
 0xd3b   : > { %5866 = vmatmul.mubr.msk.f32.vlgmr.msra.gmra.mrb[44].mxu0 %vm1647_vm2, %v4175_v19 }
 0xd3c   : > { %5874 = vmatpush3.msra.mxu0 %v3753_v20  ;;  %5875 = vmatprep.mubr.msk.f32.mxu0 %vm6278_vm1, %v6279_v23 }
 0xd3d   : > { %v4167_v21 = vpop.xlane.xlu1 %4166  ;;  %5883 = vmatprep.subr.mxu0 %v6279_v23 }
 0xd3e   : > { %6190 = vrcp.f32 %v4167_v21 }
 0xd40   : > { %v6189_v22 = vpop.eup %6188 }
 0xd41   : > { %v4179_v24 = vmul.f32 %v6189_v22, %v6181_v18  ;;  %v5270_v18 = vld [vmem:[%s7375_s15 + $0x28] sm:$0xff] }
 0xd42   : > { %v6096_v5 = vpack.c.bf16 %v5270_v18, %v5269_v4 }
 0xd43   : > { %5876 = vmatmul.mubr.msk.f32.vlgmr.msra.gmra.mrb[46].mxu0 %vm1647_vm2, %v4179_v24  ;;  %v5267_v24 = vld [vmem:[%s7373_s13 + $0x1] ss:$0 sm:$0xff] }
 0xd44   : > { %5885 = vmatprep.mubr.msk.f32.mxu0 %vm6278_vm1, %v6279_v23  ;;  %5884 = vmatpush3.msra.mxu0 %v5255_v33 }
 0xd45   : > { %v4173_v27 = vpop.xlane.xlu1 %4172  ;;  %5893 = vmatprep.subr.mxu0 %v6279_v23 }
 0xd46   : > { %6192 = vrcp.f32 %v4173_v27 }
 0xd48   : > { %v6191_v28 = vpop.eup %6190 }
 0xd49   : > { %v4177_v29 = vmul.f32 %v6191_v28, %v6183_v9  ;;  %v5277_v9 = vld [vmem:[%s7377_s17 + $0x48] sm:$0xff] }
 0xd4b   : > { %5871 = vmatmul.mubr.msk.f32.vlgmr.msra.gmra.mrb[40].mxu1 %vm1647_vm2, %v4177_v29 }
 0xd4c   : > { %5879 = vmatpush3.msra.mxu1 %v3823_v30  ;;  %5880 = vmatprep.mubr.msk.f32.mxu1 %vm6278_vm1, %v6279_v23  ;;  %v5283_v30 = vld [vmem:[%s7377_s17 + $0x78] sm:$0xff] }
 0xd4d   : > { %5888 = vmatprep.subr.mxu1 %v6279_v23 }
 0xd50   : > { %v6193_v31 = vpop.eup %6192 }
 0xd51   : > { %v4181_v32 = vmul.f32 %v6193_v31, %v6185_v12  ;;  %v6102_v12 = vpack.c.bf16 %v5277_v9, %v5276_v8 }
 0xd53   : > { %5881 = vmatmul.mubr.msk.f32.vlgmr.msra.gmra.mrb[42].mxu1 %vm1647_vm2, %v4181_v32  ;;  %v5274_v32 = vld [vmem:[%s7376_s16 + $0x1] ss:$0 sm:$0xff] }
 0xd54   : > { %5890 = vmatprep.mubr.msk.f32.mxu1 %vm6278_vm1, %v6279_v23  ;;  %5889 = vmatpush3.msra.mxu1 %v5256_v34 }
 0xd55   : > { %5898 = vmatprep.subr.mxu1 %v6279_v23 }
 0xe0e   : > { %v4251_v36 = vpop.f32.mrb[44].mxu0 }
 0xe0f   : > { %v5867_v37 = vpop.f32.mrb[45].mxu0  ;;  %5886 = vmatmul.mubr.msk.f32.vlgmr.msra.gmra.mrb[48].mxu0 %vm1647_vm2, %v4251_v36 }
 0xe10   : > { %5894 = vmatpush3.msra.mxu0 %v5257_v35  ;;  %5895 = vmatprep.mubr.msk.f32.mxu0 %vm6278_vm1, %v6279_v23  ;;  %v5285_v37 = vld [vmem:[%s7378_s18 + $0x1] ss:$0 sm:$0xff] }
 0xe11   : > { %6095 = vmatprep.subr.bf16.mxu0 %v6277_v15 }
 0xe16   : > { %v4397_v38 = vpop.f32.mrb[46].mxu0 }
 0xe17   : > { %v5877_v40 = vpop.f32.mrb[47].mxu0  ;;  %5896 = vmatmul.mubr.msk.f32.vlgmr.msra.gmra.mrb[50].mxu0 %vm1647_vm2, %v4397_v38 }
 0xe18   : > { %5911 = vmatprep.mubr.msk.f32.mxu0 %vm6278_vm1, %v6279_v23  ;;  %6097 = vmatpush3.bf16.msra.mxu0 %v6096_v5 }
 0xe19   : > { %6098 = vmatprep.subr.bf16.mxu0 %v6277_v15 }
 0xe1e   : > { %v4324_v42 = vpop.f32.mrb[40].mxu1 }
 0xe1f   : > { %v5872_v39 = vpop.f32.mrb[41].mxu1  ;;  %5891 = vmatmul.mubr.msk.f32.vlgmr.msra.gmra.mrb[44].mxu1 %vm1647_vm2, %v4324_v42 }
 0xe20   : > { %5899 = vmatpush3.msra.mxu1 %v5258_v41  ;;  %5900 = vmatprep.mubr.msk.f32.mxu1 %vm6278_vm1, %v6279_v23 }
 0xe21   : > { %6101 = vmatprep.subr.bf16.mxu1 %v6277_v15 }
 0xe26   : > { %v4470_v43 = vpop.f32.mrb[42].mxu1 }
 0xe27   : > { %v5882_v44 = vpop.f32.mrb[43].mxu1  ;;  %5901 = vmatmul.mubr.msk.f32.vlgmr.msra.gmra.mrb[46].mxu1 %vm1647_vm2, %v4470_v43 }
 0xe28   : > { %5930 = vmatprep.mubr.msk.f32.mxu1 %vm6278_vm1, %v6279_v23  ;;  %v5264_v23 = vld [vmem:[%s7372_s12 + $0x1] ss:$0 sm:$0xff]  ;;  %6103 = vmatpush3.bf16.msra.mxu1 %v6102_v12 }
 0xe29   : > { %6104 = vmatprep.subr.bf16.mxu1 %v6277_v15 }
 0xe2c   : > { %6106 = vmatpush3.bf16.msra.mxu1 %v6105_v13 }
 0xe2d   : > { %6107 = vmatprep.subr.bf16.mxu1 %v6277_v15 }
 0xe30   : > { %6109 = vmatpush3.bf16.msra.mxu1 %v6108_v17 }
 0xe31   : > { %6110 = vmatprep.subr.bf16.mxu1 %v6277_v15  ;;  %v5282_v15 = vld [vmem:[%s7377_s17 + $0x70] sm:$0xff] }
 0xe32   : > { %v6111_v31 = vpack.c.bf16 %v5283_v30, %v5282_v15 }
 0xe34   : > { %6112 = vmatpush3.bf16.msra.mxu1 %v6111_v31 }
 0xee2   : > { %v4548_v45 = vpop.f32.mrb[48].mxu0 }
 0xee3   : > { %v5887_v46 = vpop.f32.mrb[49].mxu0  ;;  %v4771_v50 = vsel %vm643_vm0, %v4548_v45, 0.0 }
 0xeea   : > { %v4694_v47 = vpop.f32.mrb[50].mxu0 }
 0xeeb   : > { %v5897_v48 = vpop.f32.mrb[51].mxu0  ;;  %v4774_v53 = vsel %vm643_vm0, %v4694_v47, 0.0 }
 0xef2   : > { %v4621_v49 = vpop.f32.mrb[44].mxu1 }
 0xef3   : > { %v4772_v51 = vsel %vm643_vm0, %v4621_v49, 0.0  ;;  %v5892_v3 = vpop.f32.mrb[45].mxu1 }
 0xef4   : > { %v4773_v52 = vadd.f32 %v4772_v51, %v4771_v50  ;;  %v5287_v3 = vld [vmem:[%s7379_s19] ss:$0 sm:$0xff] }
 0xef6   : > { %v4775_v54 = vadd.f32 %v4774_v53, %v4773_v52  ;;  %v5288_v53 = vld [vmem:[%s7425_s4] ss:$0 sm:$0xff] }
 0xefa   : > { %v4767_v55 = vpop.f32.mrb[46].mxu1 }
 0xefb   : > { %v4776_v56 = vsel %vm643_vm0, %v4767_v55, 0.0  ;;  %v5902_v57 = vpop.f32.mrb[47].mxu1 }
 0xefc   : > { %v4777_v58 = vadd.f32 %v4776_v56, %v4775_v54 }
 0xefe   : > { %v4786_v60 = vadd.f32 %v5264_v23, %v4777_v58 }
 0xf00   : > { %v4787_v61 = vadd.f32 %v4786_v60, %v6888_v26  ;;  %v5271_v26 = vld [vmem:[%s7375_s15 + $0x30] sm:$0xff] }
 0xf01   : > { %v6099_v7 = vpack.c.bf16 %v5272_v6, %v5271_v26 }
 0xf02   : > { %v4792_v62 = vsel %vm643_vm0, %v4787_v61, 0.0 }
 0xf03   : > { %4793 = vadd.xlane.f32.xlu0 %v4792_v62  ;;  %6100 = vmatpush3.bf16.msra.mxu0 %v6099_v7 }
 0xf90   : > { %v4794_v63 = vpop.xlane.xlu0 %4793 }
 0xf91   : > { %v4795_v59 = vmul.f32 0.03125, %v4794_v63 }
 0xf93   : > { %v4796_v0 = vsub.f32 %v4787_v61, %v4795_v59 }
 0xf95   : > { %v4797_v1 = vmul.f32 %v4796_v0, %v4796_v0 }
 0xf97   : > { %v4798_v2 = vsel %vm643_vm0, %v4797_v1, 0.0 }
 0xf98   : > { %4799 = vadd.xlane.f32.xlu1 %v4798_v2 }
0x1025   : > { %v4800_v19 = vpop.xlane.xlu1 %4799 }
0x1026   : > { %v4801_v20 = vmul.f32 0.03125, %v4800_v19 }
0x1028   : > { %v4802_v21 = vadd.f32 1e-05, %v4801_v20 }
0x102a   : > { %6194 = vrsqrt.f32 %v4802_v21 }
0x1034   : > { %v6195_v22 = vpop.eup %6194 }
0x1035   : > { %v4804_v27 = vmul.f32 %v6195_v22, %v4796_v0 }
0x1037   : > { %v4811_v28 = vmul.f32 %v5267_v24, %v4804_v27 }
0x1039   : > { %v4818_v29 = vadd.f32 %v5268_v25, %v4811_v28 }
0x103b   : > { %5912 = vmatmul.mubr.msk.f32.vlgmr.msra.gmra.mrb[52].mxu0 %vm643_vm0, %v4818_v29 }
0x110e   : > { %v4901_v33 = vpop.f32.mrb[52].mxu0 }
0x110f   : > { %v4902_v34 = vadd.f32 %v5274_v32, %v4901_v33  ;;  %v5913_v35 = vpop.f32.mrb[53].mxu0 }
0x1111   : > { %v4905_v36 = vmax.f32 %v4902_v34, 0.0 }
0x1113   : > { %5931 = vmatmul.mubr.msk.f32.vlgmr.msra.gmra.mrb[48].mxu1 %vm2739_vm4, %v4905_v36 }
0x11e6   : > { %v4992_v38 = vpop.f32.mrb[48].mxu1 }
0x11e7   : > { %v4993_v40 = vadd.f32 %v5285_v37, %v4992_v38  ;;  %v5932_v41 = vpop.f32.mrb[49].mxu1 }
0x11e9   : > { %v4996_v42 = vadd.f32 %v4993_v40, %v4787_v61 }
0x11eb   : > { %v4999_v39 = vsel %vm643_vm0, %v4996_v42, 0.0 }
0x11ec   : > { %5000 = vadd.xlane.f32.xlu0 %v4999_v39 }
0x1279   : > { %v5001_v43 = vpop.xlane.xlu0 %5000 }
0x127a   : > { %v5002_v44 = vmul.f32 0.03125, %v5001_v43 }
0x127c   : > { %v5003_v45 = vsub.f32 %v4996_v42, %v5002_v44 }
0x127e   : > { %v5004_v46 = vmul.f32 %v5003_v45, %v5003_v45 }
0x1280   : > { %v5005_v47 = vsel %vm643_vm0, %v5004_v46, 0.0 }
0x1281   : > { %5006 = vadd.xlane.f32.xlu1 %v5005_v47 }
0x130e   : > { %v5007_v48 = vpop.xlane.xlu1 %5006 }
0x130f   : > { %v5008_v49 = vmul.f32 0.03125, %v5007_v48 }
0x1311   : > { %v5009_v50 = vadd.f32 1e-05, %v5008_v49 }
0x1313   : > { %6196 = vrsqrt.f32 %v5009_v50 }
0x131d   : > { %v6197_v51 = vpop.eup %6196 }
0x131e   : > { %v5011_v52 = vmul.f32 %v6197_v51, %v5003_v45 }
0x1320   : > { %v5018_v54 = vmul.f32 %v5287_v3, %v5011_v52 }
0x1322   : > { %v5025_v55 = vadd.f32 %v5288_v53, %v5018_v54 }
0x1324   : > { %5026 = vst.msk [vmem:[%s627_s22] sm:$0xff] %vm643_vm0, %v5025_v55 }
0x1325   : > { %6223 = shalt.err (!%p6220_p8)
}
0x1326   : > { %s6224_s1 = scalar_lea.hbm %s7317_s7, 128  ;;  %s6228_s4 = scalar_lea.hbm %s7426_s6, 256 }
0x1327   : > { %p6225_p9 = scmp.ne.s32.totalorder %s7317_s7, %s6224_s1  ;;  %p6229_p0 = scmp.lt.u32.totalorder %s7317_s7, %s7426_s6 }
0x1328   : > { %p6230_p1 = scmp.lt.u32.totalorder %s6228_s4, %s6224_s1  ;;  %p6232_p3 = scmp.lt.u32.totalorder %s6224_s1, %s7317_s7 }
0x1329   : > { %p6226_p12 = pnand %p6225_p9, %p6432_p10 }
0x132a   : > { %p6231_p2 = por %p6230_p1, %p6229_p0 }
0x132b   : > { %p6227_p13 = pneg %p6226_p12 }
0x132c   : > { %p6233_p4 = por %p6232_p3, %p6231_p2 }
0x132e   : > { %p6234_p5 = pnand %p6233_p4, %p6227_p13 }
0x1330   : > { %6237 = shalt.err (!%p6234_p5)
}
0x1331   : > { %6113 = dma.vmem_to_hbm [thread:$0]  (%p6432_p10), %s7319_s23, 128, %s7317_s7, %s5028_s30  }
0x1332 PF: > { %s7427_s0 = sld [smem:[#allocation10_spill]]  ;;  %s7428_s5 = sld [smem:[#allocation8_spill]] }
0x1338   : > { %p6119_p6 = scmp.ge.s32.totalorder %s7427_s0, 2  ;;  %s5053_s20 = sand.u32 1, %s7428_s5  }
0x1339   : > { %s5054_s2 = scalar_lea.sflag [#allocation5], %s5053_s20 }
0x133a   : > { %p6116_p7 = pnand %p6119_p6, %p6436_p11 }
0x133c   : > { %6257 = dma.done.wait (!%p6116_p7), %s5054_s2, 128  }
0x133d   : > { %6259 = vsyncadd (!%p6116_p7), %s5054_s2, 4294967168  ;;  %s7430_s4 = sld [smem:[#allocation11_spill]]  ;;  %s7431_s1 = sld [smem:[#allocation9_spill]] }
0x133e   : > { %s7432_s0 = sld [smem:[#allocation12_spill]]  ;;  %s7433_s28 = smov %s6266_s29 }
0x1343   : > { %p37_p8 = scmp.ge.s32.totalorder %s7430_s4, 4   ;;  %s7434_s29 = smov %s7431_s1 }
0x1345   :  { %39 = sbr.rel (!%p37_p8) target bundleno = 27 (0x1b), region = 151 }
0x134c   :  { %5059 = vsyncpa [#allocation5], 1 }
0x134d   :  { %5061 = vsyncpa [#allocation5 + $0x1], 1 }

</bundles_post_ra>
